<compile_context>
chip_gen: v7x
topology: tpu7x:2x2x1
jax: 0.10.0
libtpu: 0.0.40
codegen_flags: <defaults>
</compile_context>

<pallas_src>
import functools
import numpy as np

import jax
import jax.numpy as jnp
from jax.experimental import pallas as pl
from jax.experimental.pallas import tpu as pltpu


NUM_CLASSES = 1000


def _round_up(x, m):
    return (x + m - 1) // m * m


@functools.lru_cache(maxsize=None)
def _vmem_limit_bytes():
    # v5e/v6e: 128 MiB VMEM, 1 TC -> ~87 MiB budget; v7x: 64 MiB, 2 TC -> ~43 MiB.
    try:
        cap = getattr(pltpu.get_tpu_info(), "vmem_capacity_bytes", None)
    except Exception:
        cap = None
    if not cap:
        cap = 128 * 1024 * 1024
    return int(min(96 * 1024 * 1024, cap * 0.68))


# ----------------------------------------------------------------------------
# Pallas kernel: fused (pre-ReLU) matmul + bias  (BN scale folded into weight)
# ----------------------------------------------------------------------------
def _make_fused_kernel(apply_relu):
    def kernel(x_ref, w_ref, b_ref, o_ref):
        xv = x_ref[...]                                   # (TM, K) bf16
        if apply_relu:
            xv = jnp.maximum(xv, 0)                       # bf16 ReLU (commutes with cast)
        acc = jnp.dot(xv, w_ref[...], preferred_element_type=jnp.float32)
        o_ref[...] = (acc + b_ref[...]).astype(o_ref.dtype)

    return kernel


@functools.lru_cache(maxsize=None)
def _build_fused_call(G, M, K, N_pad, TM, apply_relu, out_dtype):
    grid = (G, M // TM)
    return pl.pallas_call(
        _make_fused_kernel(apply_relu),
        out_shape=jax.ShapeDtypeStruct((G, M, N_pad), out_dtype),
        grid_spec=pltpu.PrefetchScalarGridSpec(
            num_scalar_prefetch=0,
            grid=grid,
            in_specs=[
                # activation: full K resident, tiled over M
                pl.BlockSpec((None, TM, K), lambda g, i: (g, i, 0)),
                # weight: constant index over the M axis -> fetched once per g
                pl.BlockSpec((None, K, N_pad), lambda g, i: (g, 0, 0)),
                # bias row (f32)
                pl.BlockSpec((None, 1, N_pad), lambda g, i: (g, 0, 0)),
            ],
            out_specs=pl.BlockSpec((None, TM, N_pad), lambda g, i: (g, i, 0)),
        ),
        compiler_params=pltpu.CompilerParams(
            dimension_semantics=("parallel", "parallel"),
            vmem_limit_bytes=_vmem_limit_bytes(),
        ),
    )


_TM_MAX = 2048


def _choose_tm(M, G):
    """Largest divisor of M (multiple of 8, <= _TM_MAX) that yields a grid of
    >= 2 total steps (keeps both v7x TensorCores busy under "parallel").
    Falls back to a single full-M tile for tiny layers.  Because TM | M, no
    activation padding or output slicing is ever required."""
    best = 0
    t = 8
    lim = min(M, _TM_MAX)
    while t <= lim:
        if M % t == 0 and G * (M // t) >= 2:
            best = t
        t += 8
    return best if best else M


def fused_matmul_batched(x, w, b, apply_relu, out_dtype=jnp.bfloat16):
    """out[g] = (relu(x[g]) if apply_relu else x[g]) @ w[g] + b[g].

    x: (G, M, K) bf16 (or castable) ; w: (G, K, N_pad) bf16, BN-scale already
    folded and N pre-padded ; b: (G, 1, N_pad) f32.  Returns (G, M, N_pad).
    """
    G, M, K = x.shape
    assert w.shape[0] == G and b.shape[0] == G
    N_pad = w.shape[-1]
    xb = x if x.dtype == jnp.bfloat16 else x.astype(jnp.bfloat16)
    TM = _choose_tm(M, G)
    call = _build_fused_call(G, M, K, N_pad, TM, bool(apply_relu), out_dtype)
    return call(xb, w, b)


# ----------------------------------------------------------------------------
# Layer helpers (thin JAX glue around the Pallas kernel) -- all bf16
# ----------------------------------------------------------------------------
def relu(x):
    return jnp.maximum(x, 0)


def conv_group(xs, g, apply_relu):
    """Run G 1x1conv+BN with identical (shape, Cin, Cout) in ONE pallas_call.

    xs: list of G NHWC bf16 tensors (same shape); g: pre-folded/stacked params
    {"w": (G, K, N_pad) bf16, "b": (G, 1, N_pad) f32}.
    """
    G = len(xs)
    N, H, W, C = xs[0].shape
    M = N * H * W
    if G == 1:
        x = xs[0].reshape(1, M, C)
    else:
        # single bf16 materialization of the stacked activations
        x = jnp.stack([v.reshape(M, C) for v in xs], axis=0)
    y = fused_matmul_batched(x, g["w"], g["b"], apply_relu)       # (G, M, Cout)
    Cout = g["w"].shape[-1]
    return [y[i].reshape(N, H, W, Cout) for i in range(G)]


def conv1x1_bn(x, g, apply_relu):
    return conv_group([x], g, apply_relu)[0]


def conv3x3_s2_bn(x, g, apply_relu):
    # 3x3 conv, stride 2, padding 1, + folded BN; lowered to bf16 im2col + Pallas matmul.
    # TODO(synk): the (N,Ho,Wo,9C) bf16 im2col slab is still materialized; an in-kernel
    # 9-tap reduction (Element-offset windows over the parity-reshaped padded input)
    # would remove that HBM round-trip (minor at S=16, material at the real S=56).
    # NOTE: K is ordered (ky, kx, cin); real PyTorch OIHW weights must be permuted to
    # HWIO and flattened in the same order before folding.
    N, H, W, C = x.shape
    Ho, Wo = H // 2, W // 2
    xp = jnp.pad(x, ((0, 0), (1, 1), (1, 1), (0, 0)))
    patches = [xp[:, dy:dy + 2 * Ho:2, dx:dx + 2 * Wo:2, :]
               for dy in range(3) for dx in range(3)]
    pat = jnp.concatenate(patches, axis=-1).reshape(1, N * Ho * Wo, 9 * C)
    y = fused_matmul_batched(pat, g["w"], g["b"], apply_relu)[0]
    return y.reshape(N, Ho, Wo, -1)


@functools.lru_cache(maxsize=None)
def _interp_matrix_np(n_in, n_out):
    # PyTorch bilinear, align_corners=True, as a (n_out, n_in) interpolation matrix.
    A = np.zeros((n_out, n_in), np.float32)
    if n_in == 1:
        A[:, 0] = 1.0
        return A
    denom = max(n_out - 1, 1)
    src = np.arange(n_out, dtype=np.float64) * ((n_in - 1) / denom)
    i0 = np.clip(np.floor(src).astype(np.int64), 0, n_in - 1)
    i1 = np.minimum(i0 + 1, n_in - 1)
    f = (src - i0).astype(np.float32)
    rows = np.arange(n_out)
    A[rows, i0] += 1.0 - f
    A[rows, i1] += f
    return A


def upsample_bilinear(x, scale):
    # NHWC bf16 bilinear upsample, align_corners=True, as two constant-matrix
    # contractions (separable fixed-weight interpolation -> no generic gathers).
    # Each output element mixes only 2 taps per axis, so bf16 accumulation is safe.
    N, H, W, C = x.shape
    Ho, Wo = H * scale, W * scale
    Ah = jnp.asarray(_interp_matrix_np(H, Ho), dtype=jnp.bfloat16)
    Aw = jnp.asarray(_interp_matrix_np(W, Wo), dtype=jnp.bfloat16)
    x = jnp.einsum('oh,nhwc->nowc', Ah, x)
    x = jnp.einsum('pw,nowc->nopc', Aw, x)
    return x


# ----------------------------------------------------------------------------
# Synthetic genotype
# ----------------------------------------------------------------------------
STEPS = 8  # steps == agg_steps == 8 in NasFusionNet_pre

# TODO(synk): the real `attention_snas_3_4_1` genotype and the OPS table (sep/dil
# convs, pools, attention ops) are not part of the provided source; this synthetic
# genotype uses identity ('skip_connect') ops only, keeping the cell-DAG
# (gather -> sum -> concat) semantics, preprocess stacks and shapes exact.
def _mk_indices(per_step, base, steps):
    idx = []
    for i in range(steps):
        avail = base + i
        idx.extend([(i + j) % avail for j in range(per_step)])
    return tuple(idx)


FUSION_INDICES = _mk_indices(4, 4, STEPS)
FUSION_CONCAT = tuple(range(6, 12))        # 6 states * 128 ch = 768
AGG_INDICES = _mk_indices(3, 3, STEPS)
AGG_CONCAT = tuple(range(5, 11))           # 6 states * 128 ch = 768
FINAL_INDICES = _mk_indices(4, 4, STEPS)
FINAL_CONCAT = tuple(range(6, 12))         # 6 states * 256 ch = 1536


def run_dag(inputs, indices, per_step, concat):
    # All ops are Identity in the synthetic genotype, so each step is a sum of
    # `per_step` previous states; output is channel-concat of the `concat` states.
    states = list(inputs)
    steps = len(indices) // per_step
    for i in range(steps):
        s = states[indices[per_step * i]]
        for j in range(1, per_step):
            s = s + states[indices[per_step * i + j]]
        states.append(s)
    return jnp.concatenate([states[i] for i in concat], axis=-1)


# ----------------------------------------------------------------------------
# Cells (preprocess stacks mirror the PyTorch module; BN folded to scale/bias,
# i.e. inference semantics with running statistics; bf16 conv numerics)
# ----------------------------------------------------------------------------
def fusion_cell_0(p, s0, s1, s2, s3):
    # s0 (128ch) and s2 (128ch) share shape -> one batched pallas_call
    s0p, s2p = conv_group([s0, s2], p["g02"], False)
    s1p = upsample_bilinear(conv1x1_bn(s1, p["p1rgb"], False), 2)
    s3p = conv1x1_bn(s3, p["p1d"], False)
    return run_dag([s0p, s1p, s2p, s3p], FUSION_INDICES, 4, FUSION_CONCAT)


def _fusion_pre1_rgb_deep(p, x):
    # Conv1x1+BN -> ReLU -> Up2 -> Conv1x1+BN -> Up2 (PyTorch ordering)
    t = conv1x1_bn(x, p["p1rgb_a"], False)
    t = upsample_bilinear(relu(t), 2)
    t = conv1x1_bn(t, p["p1rgb_b"], False)
    return upsample_bilinear(t, 2)


def fusion_cell_1(p, s0, s1, s2, s3):
    s0p = upsample_bilinear(conv1x1_bn(s0, p["p0rgb"], False), 2)
    s1p = _fusion_pre1_rgb_deep(p, s1)
    # both depth preprocesses are 32->128 at the same spatial size
    s2p, s3p = conv_group([s2, s3], p["g23"], False)
    return run_dag([s0p, s1p, s2p, s3p], FUSION_INDICES, 4, FUSION_CONCAT)


def fusion_cell_2(p, s0, s1, s2, s3):
    s0p = upsample_bilinear(conv1x1_bn(s0, p["p0rgb"], False), 2)
    s1p = _fusion_pre1_rgb_deep(p, s1)
    s2p = conv3x3_s2_bn(s2, p["p0d"], False)
    s3p = conv3x3_s2_bn(s3, p["p1d"], False)
    return run_dag([s0p, s1p, s2p, s3p], FUSION_INDICES, 4, FUSION_CONCAT)


def ms_cell_1(p, s0, s1, s2):
    s0p, s1p = conv_group([s0, s1], p["g01"], True)
    s2p = upsample_bilinear(conv1x1_bn(s2, p["p2"], True), 2)
    return run_dag([s0p, s1p, s2p], AGG_INDICES, 3, AGG_CONCAT)


def ms_cell_2(p, s0, s1, s2):
    s0p = upsample_bilinear(conv1x1_bn(s0, p["p0"], True), 8)
    s1p = conv1x1_bn(s1, p["p1"], True)
    s2p = conv1x1_bn(s2, p["p2"], True)
    return run_dag([s0p, s1p, s2p], AGG_INDICES, 3, AGG_CONCAT)


def ms_cell_3(p, s0, s1, s2):
    s0p = upsample_bilinear(conv1x1_bn(s0, p["p0"], True), 2)
    s1p = conv1x1_bn(s1, p["p1"], True)
    s2p = upsample_bilinear(conv1x1_bn(s2, p["p2"], True), 2)
    return run_dag([s0p, s1p, s2p], AGG_INDICES, 3, AGG_CONCAT)


def ms_cell_4(p, s0, s1, s2):
    # ReLU->Conv(512->256)+BN->Up2->ReLU->Conv(256->128)+BN->Up2
    t = upsample_bilinear(conv1x1_bn(s0, p["p0a"], True), 2)
    s0p = upsample_bilinear(conv1x1_bn(t, p["p0b"], True), 2)
    s1p = conv1x1_bn(s1, p["p1"], True)
    s2p = conv1x1_bn(s2, p["p2"], True)
    return run_dag([s0p, s1p, s2p], AGG_INDICES, 3, AGG_CONCAT)


def ga_cell(p, s0, s1, s2, s3):
    # four 768->256 ReLU-Conv-BN preprocesses, identical shapes -> one pallas_call
    s0p, s1p, s2p, s3p = conv_group([s0, s1, s2, s3], p["g0123"], True)
    return run_dag([s0p, s1p, s2p, s3p], FINAL_INDICES, 4, FINAL_CONCAT)


# ----------------------------------------------------------------------------
# Full network forward
# ----------------------------------------------------------------------------
def nas_fusion_net_forward(params, h1, h2, h3, h4, h5, d0, d1, d2, d3, d4):
    # h1 / d0 are unused by the PyTorch forward as well.
    to_nhwc = lambda t: jnp.transpose(t, (0, 2, 3, 1)).astype(jnp.bfloat16)
    h2, h3, h4, h5 = map(to_nhwc, (h2, h3, h4, h5))
    d1, d2, d3, d4 = map(to_nhwc, (d1, d2, d3, d4))

    output1 = fusion_cell_0(params["mm0"], h2, h3, d1, d2)
    output2 = fusion_cell_1(params["mm1"], h3, h4, d2, d3)
    output3 = fusion_cell_2(params["mm2"], h4, h5, d3, d4)

    agg1 = ms_cell_1(params["ms1"], output1, output2, output3)
    agg2 = ms_cell_2(params["ms2"], h5, d4, output2)
    agg3 = ms_cell_3(params["ms3"], h3, d2, output3)
    agg4 = ms_cell_4(params["ms4"], h4, d3, output1)

    agg = ga_cell(params["ga"], agg1, agg2, agg3, agg4)

    # TODO(synk): class_head = nn.AvgPool2d((56,56)); at full-size spatial 56 this is
    # a global average pool — here the spatial size S stands in for 56, so use the
    # global mean (not equivalent for other resolutions). Mean in f32 for accuracy.
    class_feature = jnp.mean(agg.astype(jnp.float32), axis=(1, 2))   # (N, 1536)

    cls = params["cls"]   # weight pre-padded to 1024 lanes at build time
    logits = fused_matmul_batched(class_feature[None], cls["w"], cls["b"],
                                  False, out_dtype=jnp.float32)[0]
    return logits[:, :NUM_CLASSES]


# ----------------------------------------------------------------------------
# Deterministic parameter construction: synthetic weights; BN folded into the
# conv weight, cast to bf16 and N-padded ONCE here (eval-mode running stats).
# ----------------------------------------------------------------------------
def build_params(key):
    keys = iter(jax.random.split(key, 160))

    def cb(cin, cout, k=1):
        kw, ks_, kb = next(keys), next(keys), next(keys)
        fan_in = k * k * cin
        w = jax.random.normal(kw, (fan_in, cout), jnp.float32) * (0.5 / np.sqrt(fan_in))
        scale = 1.0 + 0.1 * jax.random.normal(ks_, (cout,), jnp.float32)
        bias = 0.1 * jax.random.normal(kb, (cout,), jnp.float32)
        n_pad = _round_up(cout, 128)
        wf = (w * scale[None, :]).astype(jnp.bfloat16)        # fold BN scale, cast bf16
        bf = bias
        if n_pad != cout:
            wf = jnp.pad(wf, ((0, 0), (0, n_pad - cout)))
            bf = jnp.pad(bf, ((0, n_pad - cout),))
        return {"w": wf, "b": bf}

    def grp(*ps):
        # pre-stack a group of same-shape layers for one batched pallas_call
        return {"w": jnp.stack([q["w"] for q in ps], 0),
                "b": jnp.stack([q["b"] for q in ps], 0)[:, None, :]}

    p = {}
    p["mm0"] = dict(g02=grp(cb(128, 128), cb(128, 128)),      # p0rgb, p0depth
                    p1rgb=grp(cb(256, 128)),
                    p1d=grp(cb(32, 128)))
    p["mm1"] = dict(p0rgb=grp(cb(256, 128)),
                    p1rgb_a=grp(cb(512, 128)), p1rgb_b=grp(cb(128, 128)),
                    g23=grp(cb(32, 128), cb(32, 128)))        # p0depth, p1depth
    p["mm2"] = dict(p0rgb=grp(cb(512, 128)),
                    p1rgb_a=grp(cb(512, 128)), p1rgb_b=grp(cb(128, 128)),
                    p0d=grp(cb(32, 128, k=3)), p1d=grp(cb(128, 128, k=3)))
    p["ms1"] = dict(g01=grp(cb(768, 128), cb(768, 128)), p2=grp(cb(768, 128)))
    p["ms2"] = dict(p0=grp(cb(512, 128)), p1=grp(cb(128, 128)), p2=grp(cb(768, 128)))
    p["ms3"] = dict(p0=grp(cb(256, 128)), p1=grp(cb(32, 128)), p2=grp(cb(768, 128)))
    p["ms4"] = dict(p0a=grp(cb(512, 256)), p0b=grp(cb(256, 128)),
                    p1=grp(cb(32, 128)), p2=grp(cb(768, 128)))
    p["ga"] = dict(g0123=grp(cb(768, 256), cb(768, 256), cb(768, 256), cb(768, 256)))

    # classifier: Linear(1536, 1000); pre-pad N to 1024 once
    kw, kb = next(keys), next(keys)
    w = jax.random.normal(kw, (1536, NUM_CLASSES), jnp.float32) * 0.02
    b = 0.01 * jax.random.normal(kb, (NUM_CLASSES,), jnp.float32)
    n_pad = _round_up(NUM_CLASSES, 128)
    wp = jnp.pad(w.astype(jnp.bfloat16), ((0, 0), (0, n_pad - NUM_CLASSES)))
    bp = jnp.pad(b, ((0, n_pad - NUM_CLASSES),))
    p["cls"] = {"w": wp[None], "b": bp[None, None, :]}
    return p


# ----------------------------------------------------------------------------
# Main
# ----------------------------------------------------------------------------
if __name__ == "__main__":
    N, S = 2, 16  # small spatial scale; original network would use S = 56

    params = build_params(jax.random.PRNGKey(1))

    key = jax.random.PRNGKey(0)
    ks = jax.random.split(key, 10)
    h1 = jax.random.normal(ks[0], (N, 64, 2 * S, 2 * S), jnp.float32)   # unused
    h2 = jax.random.normal(ks[1], (N, 128, S, S), jnp.float32)
    h3 = jax.random.normal(ks[2], (N, 256, S // 2, S // 2), jnp.float32)
    h4 = jax.random.normal(ks[3], (N, 512, S // 4, S // 4), jnp.float32)
    h5 = jax.random.normal(ks[4], (N, 512, S // 8, S // 8), jnp.float32)
    d0 = jax.random.normal(ks[5], (N, 64, 2 * S, 2 * S), jnp.float32)   # unused
    d1 = jax.random.normal(ks[6], (N, 128, S, S), jnp.float32)
    d2 = jax.random.normal(ks[7], (N, 32, S, S), jnp.float32)
    d3 = jax.random.normal(ks[8], (N, 32, S, S), jnp.float32)
    d4 = jax.random.normal(ks[9], (N, 128, S, S), jnp.float32)

    fwd = jax.jit(nas_fusion_net_forward)
    logits = fwd(params, h1, h2, h3, h4, h5, d0, d1, d2, d3, d4)
    jax.block_until_ready(logits)

    assert logits.shape == (N, NUM_CLASSES), logits.shape
    assert bool(jnp.all(jnp.isfinite(logits)))
    print("KERNEL_OK")
</pallas_src>

<mosaic_0001>
module attributes {stable_mosaic.version = 11 : i64} {
  func.func @kernel(%arg0: i32, %arg1: i32, %arg2: memref<1x8x512xbf16, #tpu.memory_space<vmem>>, %arg3: memref<1x512x128xbf16, #tpu.memory_space<vmem>>, %arg4: memref<1x1x128xf32, #tpu.memory_space<vmem>>, %arg5: memref<1x8x128xbf16, #tpu.memory_space<vmem>>) attributes {dimension_semantics = [#tpu.dimension_semantics<parallel>, #tpu.dimension_semantics<parallel>], iteration_bounds = array<i64: 1, 1>, scalar_prefetch = 0 : i64, scratch_operands = 0 : i64, tpu.core_type = #tpu.core_type<tc>, window_params = [{transform_indices = @transform_0, window_bounds = array<i64: 1, 8, 512>}, {transform_indices = @transform_1, window_bounds = array<i64: 1, 512, 128>}, {transform_indices = @transform_2, window_bounds = array<i64: 1, 1, 128>}, {transform_indices = @transform_3, window_bounds = array<i64: 1, 8, 128>}]} {
    %c0 = arith.constant 0 : index
    %c0_0 = arith.constant 0 : index
    %c0_1 = arith.constant 0 : index
    %0 = vector.load %arg2[%c0, %c0_0, %c0_1] : memref<1x8x512xbf16, #tpu.memory_space<vmem>>, vector<1x8x512xbf16>
    %1 = vector.shape_cast %0 : vector<1x8x512xbf16> to vector<8x512xbf16>
    %c0_2 = arith.constant 0 : index
    %c0_3 = arith.constant 0 : index
    %c0_4 = arith.constant 0 : index
    %2 = vector.load %arg3[%c0_2, %c0_3, %c0_4] : memref<1x512x128xbf16, #tpu.memory_space<vmem>>, vector<1x512x128xbf16>
    %3 = vector.shape_cast %2 : vector<1x512x128xbf16> to vector<512x128xbf16>
    %cst = arith.constant dense<0.000000e+00> : vector<8x128xf32>
    %4 = tpu.matmul %1, %3, %cst {dimension_numbers = #tpu.dot_dimension_numbers<[1], [0], [0], [1], [0, 0, 1, 1], [], []>} : vector<8x512xbf16>, vector<512x128xbf16>, vector<8x128xf32> -> vector<8x128xf32>
    %c0_5 = arith.constant 0 : index
    %c0_6 = arith.constant 0 : index
    %c0_7 = arith.constant 0 : index
    %5 = vector.load %arg4[%c0_5, %c0_6, %c0_7] : memref<1x1x128xf32, #tpu.memory_space<vmem>>, vector<1x1x128xf32>
    %6 = vector.shape_cast %5 : vector<1x1x128xf32> to vector<1x128xf32>
    %7 = vector.broadcast %6 : vector<1x128xf32> to vector<8x128xf32>
    %8 = arith.addf %4, %7 : vector<8x128xf32>
    %9 = arith.truncf %8 : vector<8x128xf32> to vector<8x128xbf16>
    %c0_8 = arith.constant 0 : index
    %c0_9 = arith.constant 0 : index
    %c0_10 = arith.constant 0 : index
    %10 = vector.load %arg5[%c0_8, %c0_9, %c0_10] : memref<1x8x128xbf16, #tpu.memory_space<vmem>>, vector<1x8x128xbf16>
    %11 = vector.shape_cast %10 : vector<1x8x128xbf16> to vector<8x128xbf16>
    %12 = vector.shape_cast %9 : vector<8x128xbf16> to vector<1x8x128xbf16>
    tpu.vector_store %arg5[%c0_8, %c0_9, %c0_10], %12 {strides = array<i32>} : memref<1x8x128xbf16, #tpu.memory_space<vmem>>, vector<1x8x128xbf16>,
    return
  }
  func.func @transform_0(%arg0: i32, %arg1: i32) -> (i32, i32, i32) {
    %c0_i32 = arith.constant 0 : i32
    %c0_i32_0 = arith.constant 0 : i32
    return %arg0, %arg1, %c0_i32 : i32, i32, i32
  }
  func.func @transform_1(%arg0: i32, %arg1: i32) -> (i32, i32, i32) {
    %c0_i32 = arith.constant 0 : i32
    %c0_i32_0 = arith.constant 0 : i32
    %c0_i32_1 = arith.constant 0 : i32
    return %arg0, %c0_i32, %c0_i32_0 : i32, i32, i32
  }
  func.func @transform_2(%arg0: i32, %arg1: i32) -> (i32, i32, i32) {
    %c0_i32 = arith.constant 0 : i32
    %c0_i32_0 = arith.constant 0 : i32
    %c0_i32_1 = arith.constant 0 : i32
    return %arg0, %c0_i32, %c0_i32_0 : i32, i32, i32
  }
  func.func @transform_3(%arg0: i32, %arg1: i32) -> (i32, i32, i32) {
    %c0_i32 = arith.constant 0 : i32
    %c0_i32_0 = arith.constant 0 : i32
    return %arg0, %arg1, %c0_i32 : i32, i32, i32
  }
}

module attributes {stable_mosaic.version = 11 : i64} {
  func.func @kernel(%arg0: i32, %arg1: i32, %arg2: memref<1x8x512xbf16, #tpu.memory_space<vmem>>, %arg3: memref<1x512x128xbf16, #tpu.memory_space<vmem>>, %arg4: memref<1x1x128xf32, #tpu.memory_space<vmem>>, %arg5: memref<1x8x128xbf16, #tpu.memory_space<vmem>>) attributes {dimension_semantics = [#tpu.dimension_semantics<parallel>, #tpu.dimension_semantics<parallel>], iteration_bounds = array<i64: 1, 1>, scalar_prefetch = 0 : i64, scratch_operands = 0 : i64, tpu.core_type = #tpu.core_type<tc>, window_params = [{transform_indices = @transform_0, window_bounds = array<i64: 1, 8, 512>}, {transform_indices = @transform_1, window_bounds = array<i64: 1, 512, 128>}, {transform_indices = @transform_2, window_bounds = array<i64: 1, 1, 128>}, {transform_indices = @transform_3, window_bounds = array<i64: 1, 8, 128>}]} {
    %c0 = arith.constant 0 : index
    %c0_0 = arith.constant 0 : index
    %c0_1 = arith.constant 0 : index
    %0 = vector.load %arg2[%c0, %c0_0, %c0_1] : memref<1x8x512xbf16, #tpu.memory_space<vmem>>, vector<1x8x512xbf16>
    %1 = vector.shape_cast %0 : vector<1x8x512xbf16> to vector<8x512xbf16>
    %cst = arith.constant 0.000000e+00 : bf16
    %2 = vector.broadcast %cst : bf16 to vector<8x512xbf16>
    %3 = arith.maximumf %1, %2 : vector<8x512xbf16>
    %c0_2 = arith.constant 0 : index
    %c0_3 = arith.constant 0 : index
    %c0_4 = arith.constant 0 : index
    %4 = vector.load %arg3[%c0_2, %c0_3, %c0_4] : memref<1x512x128xbf16, #tpu.memory_space<vmem>>, vector<1x512x128xbf16>
    %5 = vector.shape_cast %4 : vector<1x512x128xbf16> to vector<512x128xbf16>
    %cst_5 = arith.constant dense<0.000000e+00> : vector<8x128xf32>
    %6 = tpu.matmul %3, %5, %cst_5 {dimension_numbers = #tpu.dot_dimension_numbers<[1], [0], [0], [1], [0, 0, 1, 1], [], []>} : vector<8x512xbf16>, vector<512x128xbf16>, vector<8x128xf32> -> vector<8x128xf32>
    %c0_6 = arith.constant 0 : index
    %c0_7 = arith.constant 0 : index
    %c0_8 = arith.constant 0 : index
    %7 = vector.load %arg4[%c0_6, %c0_7, %c0_8] : memref<1x1x128xf32, #tpu.memory_space<vmem>>, vector<1x1x128xf32>
    %8 = vector.shape_cast %7 : vector<1x1x128xf32> to vector<1x128xf32>
    %9 = vector.broadcast %8 : vector<1x128xf32> to vector<8x128xf32>
    %10 = arith.addf %6, %9 : vector<8x128xf32>
    %11 = arith.truncf %10 : vector<8x128xf32> to vector<8x128xbf16>
    %c0_9 = arith.constant 0 : index
    %c0_10 = arith.constant 0 : index
    %c0_11 = arith.constant 0 : index
    %12 = vector.load %arg5[%c0_9, %c0_10, %c0_11] : memref<1x8x128xbf16, #tpu.memory_space<vmem>>, vector<1x8x128xbf16>
    %13 = vector.shape_cast %12 : vector<1x8x128xbf16> to vector<8x128xbf16>
    %14 = vector.shape_cast %11 : vector<8x128xbf16> to vector<1x8x128xbf16>
    tpu.vector_store %arg5[%c0_9, %c0_10, %c0_11], %14 {strides = array<i32>} : memref<1x8x128xbf16, #tpu.memory_space<vmem>>, vector<1x8x128xbf16>,
    return
  }
  func.func @transform_0(%arg0: i32, %arg1: i32) -> (i32, i32, i32) {
    %c0_i32 = arith.constant 0 : i32
    %c0_i32_0 = arith.constant 0 : i32
    return %arg0, %arg1, %c0_i32 : i32, i32, i32
  }
  func.func @transform_1(%arg0: i32, %arg1: i32) -> (i32, i32, i32) {
    %c0_i32 = arith.constant 0 : i32
    %c0_i32_0 = arith.constant 0 : i32
    %c0_i32_1 = arith.constant 0 : i32
    return %arg0, %c0_i32, %c0_i32_0 : i32, i32, i32
  }
  func.func @transform_2(%arg0: i32, %arg1: i32) -> (i32, i32, i32) {
    %c0_i32 = arith.constant 0 : i32
    %c0_i32_0 = arith.constant 0 : i32
    %c0_i32_1 = arith.constant 0 : i32
    return %arg0, %c0_i32, %c0_i32_0 : i32, i32, i32
  }
  func.func @transform_3(%arg0: i32, %arg1: i32) -> (i32, i32, i32) {
    %c0_i32 = arith.constant 0 : i32
    %c0_i32_0 = arith.constant 0 : i32
    return %arg0, %arg1, %c0_i32 : i32, i32, i32
  }
}

module attributes {stable_mosaic.version = 11 : i64} {
  func.func @kernel(%arg0: i32, %arg1: i32, %arg2: memref<1x16x128xbf16, #tpu.memory_space<vmem>>, %arg3: memref<1x128x128xbf16, #tpu.memory_space<vmem>>, %arg4: memref<1x1x128xf32, #tpu.memory_space<vmem>>, %arg5: memref<1x16x128xbf16, #tpu.memory_space<vmem>>) attributes {dimension_semantics = [#tpu.dimension_semantics<parallel>, #tpu.dimension_semantics<parallel>], iteration_bounds = array<i64: 1, 2>, scalar_prefetch = 0 : i64, scratch_operands = 0 : i64, tpu.core_type = #tpu.core_type<tc>, window_params = [{transform_indices = @transform_0, window_bounds = array<i64: 1, 16, 128>}, {transform_indices = @transform_1, window_bounds = array<i64: 1, 128, 128>}, {transform_indices = @transform_2, window_bounds = array<i64: 1, 1, 128>}, {transform_indices = @transform_3, window_bounds = array<i64: 1, 16, 128>}]} {
    %c0 = arith.constant 0 : index
    %c0_0 = arith.constant 0 : index
    %c0_1 = arith.constant 0 : index
    %0 = vector.load %arg2[%c0, %c0_0, %c0_1] : memref<1x16x128xbf16, #tpu.memory_space<vmem>>, vector<1x16x128xbf16>
    %1 = vector.shape_cast %0 : vector<1x16x128xbf16> to vector<16x128xbf16>
    %c0_2 = arith.constant 0 : index
    %c0_3 = arith.constant 0 : index
    %c0_4 = arith.constant 0 : index
    %2 = vector.load %arg3[%c0_2, %c0_3, %c0_4] : memref<1x128x128xbf16, #tpu.memory_space<vmem>>, vector<1x128x128xbf16>
    %3 = vector.shape_cast %2 : vector<1x128x128xbf16> to vector<128x128xbf16>
    %cst = arith.constant dense<0.000000e+00> : vector<16x128xf32>
    %4 = tpu.matmul %1, %3, %cst {dimension_numbers = #tpu.dot_dimension_numbers<[1], [0], [0], [1], [0, 0, 1, 1], [], []>} : vector<16x128xbf16>, vector<128x128xbf16>, vector<16x128xf32> -> vector<16x128xf32>
    %c0_5 = arith.constant 0 : index
    %c0_6 = arith.constant 0 : index
    %c0_7 = arith.constant 0 : index
    %5 = vector.load %arg4[%c0_5, %c0_6, %c0_7] : memref<1x1x128xf32, #tpu.memory_space<vmem>>, vector<1x1x128xf32>
    %6 = vector.shape_cast %5 : vector<1x1x128xf32> to vector<1x128xf32>
    %7 = vector.broadcast %6 : vector<1x128xf32> to vector<16x128xf32>
    %8 = arith.addf %4, %7 : vector<16x128xf32>
    %9 = arith.truncf %8 : vector<16x128xf32> to vector<16x128xbf16>
    %c0_8 = arith.constant 0 : index
    %c0_9 = arith.constant 0 : index
    %c0_10 = arith.constant 0 : index
    %10 = vector.load %arg5[%c0_8, %c0_9, %c0_10] : memref<1x16x128xbf16, #tpu.memory_space<vmem>>, vector<1x16x128xbf16>
    %11 = vector.shape_cast %10 : vector<1x16x128xbf16> to vector<16x128xbf16>
    %12 = vector.shape_cast %9 : vector<16x128xbf16> to vector<1x16x128xbf16>
    tpu.vector_store %arg5[%c0_8, %c0_9, %c0_10], %12 {strides = array<i32>} : memref<1x16x128xbf16, #tpu.memory_space<vmem>>, vector<1x16x128xbf16>,
    return
  }
  func.func @transform_0(%arg0: i32, %arg1: i32) -> (i32, i32, i32) {
    %c0_i32 = arith.constant 0 : i32
    %c0_i32_0 = arith.constant 0 : i32
    return %arg0, %arg1, %c0_i32 : i32, i32, i32
  }
  func.func @transform_1(%arg0: i32, %arg1: i32) -> (i32, i32, i32) {
    %c0_i32 = arith.constant 0 : i32
    %c0_i32_0 = arith.constant 0 : i32
    %c0_i32_1 = arith.constant 0 : i32
    return %arg0, %c0_i32, %c0_i32_0 : i32, i32, i32
  }
  func.func @transform_2(%arg0: i32, %arg1: i32) -> (i32, i32, i32) {
    %c0_i32 = arith.constant 0 : i32
    %c0_i32_0 = arith.constant 0 : i32
    %c0_i32_1 = arith.constant 0 : i32
    return %arg0, %c0_i32, %c0_i32_0 : i32, i32, i32
  }
  func.func @transform_3(%arg0: i32, %arg1: i32) -> (i32, i32, i32) {
    %c0_i32 = arith.constant 0 : i32
    %c0_i32_0 = arith.constant 0 : i32
    return %arg0, %arg1, %c0_i32 : i32, i32, i32
  }
}

module attributes {stable_mosaic.version = 11 : i64} {
  func.func @kernel(%arg0: i32, %arg1: i32, %arg2: memref<1x16x512xbf16, #tpu.memory_space<vmem>>, %arg3: memref<1x512x256xbf16, #tpu.memory_space<vmem>>, %arg4: memref<1x1x256xf32, #tpu.memory_space<vmem>>, %arg5: memref<1x16x256xbf16, #tpu.memory_space<vmem>>) attributes {dimension_semantics = [#tpu.dimension_semantics<parallel>, #tpu.dimension_semantics<parallel>], iteration_bounds = array<i64: 1, 2>, scalar_prefetch = 0 : i64, scratch_operands = 0 : i64, tpu.core_type = #tpu.core_type<tc>, window_params = [{transform_indices = @transform_0, window_bounds = array<i64: 1, 16, 512>}, {transform_indices = @transform_1, window_bounds = array<i64: 1, 512, 256>}, {transform_indices = @transform_2, window_bounds = array<i64: 1, 1, 256>}, {transform_indices = @transform_3, window_bounds = array<i64: 1, 16, 256>}]} {
    %c0 = arith.constant 0 : index
    %c0_0 = arith.constant 0 : index
    %c0_1 = arith.constant 0 : index
    %0 = vector.load %arg2[%c0, %c0_0, %c0_1] : memref<1x16x512xbf16, #tpu.memory_space<vmem>>, vector<1x16x512xbf16>
    %1 = vector.shape_cast %0 : vector<1x16x512xbf16> to vector<16x512xbf16>
    %cst = arith.constant 0.000000e+00 : bf16
    %2 = vector.broadcast %cst : bf16 to vector<16x512xbf16>
    %3 = arith.maximumf %1, %2 : vector<16x512xbf16>
    %c0_2 = arith.constant 0 : index
    %c0_3 = arith.constant 0 : index
    %c0_4 = arith.constant 0 : index
    %4 = vector.load %arg3[%c0_2, %c0_3, %c0_4] : memref<1x512x256xbf16, #tpu.memory_space<vmem>>, vector<1x512x256xbf16>
    %5 = vector.shape_cast %4 : vector<1x512x256xbf16> to vector<512x256xbf16>
    %cst_5 = arith.constant dense<0.000000e+00> : vector<16x256xf32>
    %6 = tpu.matmul %3, %5, %cst_5 {dimension_numbers = #tpu.dot_dimension_numbers<[1], [0], [0], [1], [0, 0, 1, 1], [], []>} : vector<16x512xbf16>, vector<512x256xbf16>, vector<16x256xf32> -> vector<16x256xf32>
    %c0_6 = arith.constant 0 : index
    %c0_7 = arith.constant 0 : index
    %c0_8 = arith.constant 0 : index
    %7 = vector.load %arg4[%c0_6, %c0_7, %c0_8] : memref<1x1x256xf32, #tpu.memory_space<vmem>>, vector<1x1x256xf32>
    %8 = vector.shape_cast %7 : vector<1x1x256xf32> to vector<1x256xf32>
    %9 = vector.broadcast %8 : vector<1x256xf32> to vector<16x256xf32>
    %10 = arith.addf %6, %9 : vector<16x256xf32>
    %11 = arith.truncf %10 : vector<16x256xf32> to vector<16x256xbf16>
    %c0_9 = arith.constant 0 : index
    %c0_10 = arith.constant 0 : index
    %c0_11 = arith.constant 0 : index
    %12 = vector.load %arg5[%c0_9, %c0_10, %c0_11] : memref<1x16x256xbf16, #tpu.memory_space<vmem>>, vector<1x16x256xbf16>
    %13 = vector.shape_cast %12 : vector<1x16x256xbf16> to vector<16x256xbf16>
    %14 = vector.shape_cast %11 : vector<16x256xbf16> to vector<1x16x256xbf16>
    tpu.vector_store %arg5[%c0_9, %c0_10, %c0_11], %14 {strides = array<i32>} : memref<1x16x256xbf16, #tpu.memory_space<vmem>>, vector<1x16x256xbf16>,
    return
  }
  func.func @transform_0(%arg0: i32, %arg1: i32) -> (i32, i32, i32) {
    %c0_i32 = arith.constant 0 : i32
    %c0_i32_0 = arith.constant 0 : i32
    return %arg0, %arg1, %c0_i32 : i32, i32, i32
  }
  func.func @transform_1(%arg0: i32, %arg1: i32) -> (i32, i32, i32) {
    %c0_i32 = arith.constant 0 : i32
    %c0_i32_0 = arith.constant 0 : i32
    %c0_i32_1 = arith.constant 0 : i32
    return %arg0, %c0_i32, %c0_i32_0 : i32, i32, i32
  }
  func.func @transform_2(%arg0: i32, %arg1: i32) -> (i32, i32, i32) {
    %c0_i32 = arith.constant 0 : i32
    %c0_i32_0 = arith.constant 0 : i32
    %c0_i32_1 = arith.constant 0 : i32
    return %arg0, %c0_i32, %c0_i32_0 : i32, i32, i32
  }
  func.func @transform_3(%arg0: i32, %arg1: i32) -> (i32, i32, i32) {
    %c0_i32 = arith.constant 0 : i32
    %c0_i32_0 = arith.constant 0 : i32
    return %arg0, %arg1, %c0_i32 : i32, i32, i32
  }
}

module attributes {stable_mosaic.version = 11 : i64} {
  func.func @kernel(%arg0: i32, %arg1: i32, %arg2: memref<1x16x512xbf16, #tpu.memory_space<vmem>>, %arg3: memref<1x512x128xbf16, #tpu.memory_space<vmem>>, %arg4: memref<1x1x128xf32, #tpu.memory_space<vmem>>, %arg5: memref<1x16x128xbf16, #tpu.memory_space<vmem>>) attributes {dimension_semantics = [#tpu.dimension_semantics<parallel>, #tpu.dimension_semantics<parallel>], iteration_bounds = array<i64: 1, 2>, scalar_prefetch = 0 : i64, scratch_operands = 0 : i64, tpu.core_type = #tpu.core_type<tc>, window_params = [{transform_indices = @transform_0, window_bounds = array<i64: 1, 16, 512>}, {transform_indices = @transform_1, window_bounds = array<i64: 1, 512, 128>}, {transform_indices = @transform_2, window_bounds = array<i64: 1, 1, 128>}, {transform_indices = @transform_3, window_bounds = array<i64: 1, 16, 128>}]} {
    %c0 = arith.constant 0 : index
    %c0_0 = arith.constant 0 : index
    %c0_1 = arith.constant 0 : index
    %0 = vector.load %arg2[%c0, %c0_0, %c0_1] : memref<1x16x512xbf16, #tpu.memory_space<vmem>>, vector<1x16x512xbf16>
    %1 = vector.shape_cast %0 : vector<1x16x512xbf16> to vector<16x512xbf16>
    %c0_2 = arith.constant 0 : index
    %c0_3 = arith.constant 0 : index
    %c0_4 = arith.constant 0 : index
    %2 = vector.load %arg3[%c0_2, %c0_3, %c0_4] : memref<1x512x128xbf16, #tpu.memory_space<vmem>>, vector<1x512x128xbf16>
    %3 = vector.shape_cast %2 : vector<1x512x128xbf16> to vector<512x128xbf16>
    %cst = arith.constant dense<0.000000e+00> : vector<16x128xf32>
    %4 = tpu.matmul %1, %3, %cst {dimension_numbers = #tpu.dot_dimension_numbers<[1], [0], [0], [1], [0, 0, 1, 1], [], []>} : vector<16x512xbf16>, vector<512x128xbf16>, vector<16x128xf32> -> vector<16x128xf32>
    %c0_5 = arith.constant 0 : index
    %c0_6 = arith.constant 0 : index
    %c0_7 = arith.constant 0 : index
    %5 = vector.load %arg4[%c0_5, %c0_6, %c0_7] : memref<1x1x128xf32, #tpu.memory_space<vmem>>, vector<1x1x128xf32>
    %6 = vector.shape_cast %5 : vector<1x1x128xf32> to vector<1x128xf32>
    %7 = vector.broadcast %6 : vector<1x128xf32> to vector<16x128xf32>
    %8 = arith.addf %4, %7 : vector<16x128xf32>
    %9 = arith.truncf %8 : vector<16x128xf32> to vector<16x128xbf16>
    %c0_8 = arith.constant 0 : index
    %c0_9 = arith.constant 0 : index
    %c0_10 = arith.constant 0 : index
    %10 = vector.load %arg5[%c0_8, %c0_9, %c0_10] : memref<1x16x128xbf16, #tpu.memory_space<vmem>>, vector<1x16x128xbf16>
    %11 = vector.shape_cast %10 : vector<1x16x128xbf16> to vector<16x128xbf16>
    %12 = vector.shape_cast %9 : vector<16x128xbf16> to vector<1x16x128xbf16>
    tpu.vector_store %arg5[%c0_8, %c0_9, %c0_10], %12 {strides = array<i32>} : memref<1x16x128xbf16, #tpu.memory_space<vmem>>, vector<1x16x128xbf16>,
    return
  }
  func.func @transform_0(%arg0: i32, %arg1: i32) -> (i32, i32, i32) {
    %c0_i32 = arith.constant 0 : i32
    %c0_i32_0 = arith.constant 0 : i32
    return %arg0, %arg1, %c0_i32 : i32, i32, i32
  }
  func.func @transform_1(%arg0: i32, %arg1: i32) -> (i32, i32, i32) {
    %c0_i32 = arith.constant 0 : i32
    %c0_i32_0 = arith.constant 0 : i32
    %c0_i32_1 = arith.constant 0 : i32
    return %arg0, %c0_i32, %c0_i32_0 : i32, i32, i32
  }
  func.func @transform_2(%arg0: i32, %arg1: i32) -> (i32, i32, i32) {
    %c0_i32 = arith.constant 0 : i32
    %c0_i32_0 = arith.constant 0 : i32
    %c0_i32_1 = arith.constant 0 : i32
    return %arg0, %c0_i32, %c0_i32_0 : i32, i32, i32
  }
  func.func @transform_3(%arg0: i32, %arg1: i32) -> (i32, i32, i32) {
    %c0_i32 = arith.constant 0 : i32
    %c0_i32_0 = arith.constant 0 : i32
    return %arg0, %arg1, %c0_i32 : i32, i32, i32
  }
}

module attributes {stable_mosaic.version = 11 : i64} {
  func.func @kernel(%arg0: i32, %arg1: i32, %arg2: memref<1x64x128xbf16, #tpu.memory_space<vmem>>, %arg3: memref<1x128x128xbf16, #tpu.memory_space<vmem>>, %arg4: memref<1x1x128xf32, #tpu.memory_space<vmem>>, %arg5: memref<1x64x128xbf16, #tpu.memory_space<vmem>>) attributes {dimension_semantics = [#tpu.dimension_semantics<parallel>, #tpu.dimension_semantics<parallel>], iteration_bounds = array<i64: 1, 2>, scalar_prefetch = 0 : i64, scratch_operands = 0 : i64, tpu.core_type = #tpu.core_type<tc>, window_params = [{transform_indices = @transform_0, window_bounds = array<i64: 1, 64, 128>}, {transform_indices = @transform_1, window_bounds = array<i64: 1, 128, 128>}, {transform_indices = @transform_2, window_bounds = array<i64: 1, 1, 128>}, {transform_indices = @transform_3, window_bounds = array<i64: 1, 64, 128>}]} {
    %c0 = arith.constant 0 : index
    %c0_0 = arith.constant 0 : index
    %c0_1 = arith.constant 0 : index
    %0 = vector.load %arg2[%c0, %c0_0, %c0_1] : memref<1x64x128xbf16, #tpu.memory_space<vmem>>, vector<1x64x128xbf16>
    %1 = vector.shape_cast %0 : vector<1x64x128xbf16> to vector<64x128xbf16>
    %c0_2 = arith.constant 0 : index
    %c0_3 = arith.constant 0 : index
    %c0_4 = arith.constant 0 : index
    %2 = vector.load %arg3[%c0_2, %c0_3, %c0_4] : memref<1x128x128xbf16, #tpu.memory_space<vmem>>, vector<1x128x128xbf16>
    %3 = vector.shape_cast %2 : vector<1x128x128xbf16> to vector<128x128xbf16>
    %cst = arith.constant dense<0.000000e+00> : vector<64x128xf32>
    %4 = tpu.matmul %1, %3, %cst {dimension_numbers = #tpu.dot_dimension_numbers<[1], [0], [0], [1], [0, 0, 1, 1], [], []>} : vector<64x128xbf16>, vector<128x128xbf16>, vector<64x128xf32> -> vector<64x128xf32>
    %c0_5 = arith.constant 0 : index
    %c0_6 = arith.constant 0 : index
    %c0_7 = arith.constant 0 : index
    %5 = vector.load %arg4[%c0_5, %c0_6, %c0_7] : memref<1x1x128xf32, #tpu.memory_space<vmem>>, vector<1x1x128xf32>
    %6 = vector.shape_cast %5 : vector<1x1x128xf32> to vector<1x128xf32>
    %7 = vector.broadcast %6 : vector<1x128xf32> to vector<64x128xf32>
    %8 = arith.addf %4, %7 : vector<64x128xf32>
    %9 = arith.truncf %8 : vector<64x128xf32> to vector<64x128xbf16>
    %c0_8 = arith.constant 0 : index
    %c0_9 = arith.constant 0 : index
    %c0_10 = arith.constant 0 : index
    %10 = vector.load %arg5[%c0_8, %c0_9, %c0_10] : memref<1x64x128xbf16, #tpu.memory_space<vmem>>, vector<1x64x128xbf16>
    %11 = vector.shape_cast %10 : vector<1x64x128xbf16> to vector<64x128xbf16>
    %12 = vector.shape_cast %9 : vector<64x128xbf16> to vector<1x64x128xbf16>
    tpu.vector_store %arg5[%c0_8, %c0_9, %c0_10], %12 {strides = array<i32>} : memref<1x64x128xbf16, #tpu.memory_space<vmem>>, vector<1x64x128xbf16>,
    return
  }
  func.func @transform_0(%arg0: i32, %arg1: i32) -> (i32, i32, i32) {
    %c0_i32 = arith.constant 0 : i32
    %c0_i32_0 = arith.constant 0 : i32
    return %arg0, %arg1, %c0_i32 : i32, i32, i32
  }
  func.func @transform_1(%arg0: i32, %arg1: i32) -> (i32, i32, i32) {
    %c0_i32 = arith.constant 0 : i32
    %c0_i32_0 = arith.constant 0 : i32
    %c0_i32_1 = arith.constant 0 : i32
    return %arg0, %c0_i32, %c0_i32_0 : i32, i32, i32
  }
  func.func @transform_2(%arg0: i32, %arg1: i32) -> (i32, i32, i32) {
    %c0_i32 = arith.constant 0 : i32
    %c0_i32_0 = arith.constant 0 : i32
    %c0_i32_1 = arith.constant 0 : i32
    return %arg0, %c0_i32, %c0_i32_0 : i32, i32, i32
  }
  func.func @transform_3(%arg0: i32, %arg1: i32) -> (i32, i32, i32) {
    %c0_i32 = arith.constant 0 : i32
    %c0_i32_0 = arith.constant 0 : i32
    return %arg0, %arg1, %c0_i32 : i32, i32, i32
  }
}

module attributes {stable_mosaic.version = 11 : i64} {
  func.func @kernel(%arg0: i32, %arg1: i32, %arg2: memref<1x64x256xbf16, #tpu.memory_space<vmem>>, %arg3: memref<1x256x128xbf16, #tpu.memory_space<vmem>>, %arg4: memref<1x1x128xf32, #tpu.memory_space<vmem>>, %arg5: memref<1x64x128xbf16, #tpu.memory_space<vmem>>) attributes {dimension_semantics = [#tpu.dimension_semantics<parallel>, #tpu.dimension_semantics<parallel>], iteration_bounds = array<i64: 1, 2>, scalar_prefetch = 0 : i64, scratch_operands = 0 : i64, tpu.core_type = #tpu.core_type<tc>, window_params = [{transform_indices = @transform_0, window_bounds = array<i64: 1, 64, 256>}, {transform_indices = @transform_1, window_bounds = array<i64: 1, 256, 128>}, {transform_indices = @transform_2, window_bounds = array<i64: 1, 1, 128>}, {transform_indices = @transform_3, window_bounds = array<i64: 1, 64, 128>}]} {
    %c0 = arith.constant 0 : index
    %c0_0 = arith.constant 0 : index
    %c0_1 = arith.constant 0 : index
    %0 = vector.load %arg2[%c0, %c0_0, %c0_1] : memref<1x64x256xbf16, #tpu.memory_space<vmem>>, vector<1x64x256xbf16>
    %1 = vector.shape_cast %0 : vector<1x64x256xbf16> to vector<64x256xbf16>
    %cst = arith.constant 0.000000e+00 : bf16
    %2 = vector.broadcast %cst : bf16 to vector<64x256xbf16>
    %3 = arith.maximumf %1, %2 : vector<64x256xbf16>
    %c0_2 = arith.constant 0 : index
    %c0_3 = arith.constant 0 : index
    %c0_4 = arith.constant 0 : index
    %4 = vector.load %arg3[%c0_2, %c0_3, %c0_4] : memref<1x256x128xbf16, #tpu.memory_space<vmem>>, vector<1x256x128xbf16>
    %5 = vector.shape_cast %4 : vector<1x256x128xbf16> to vector<256x128xbf16>
    %cst_5 = arith.constant dense<0.000000e+00> : vector<64x128xf32>
    %6 = tpu.matmul %3, %5, %cst_5 {dimension_numbers = #tpu.dot_dimension_numbers<[1], [0], [0], [1], [0, 0, 1, 1], [], []>} : vector<64x256xbf16>, vector<256x128xbf16>, vector<64x128xf32> -> vector<64x128xf32>
    %c0_6 = arith.constant 0 : index
    %c0_7 = arith.constant 0 : index
    %c0_8 = arith.constant 0 : index
    %7 = vector.load %arg4[%c0_6, %c0_7, %c0_8] : memref<1x1x128xf32, #tpu.memory_space<vmem>>, vector<1x1x128xf32>
    %8 = vector.shape_cast %7 : vector<1x1x128xf32> to vector<1x128xf32>
    %9 = vector.broadcast %8 : vector<1x128xf32> to vector<64x128xf32>
    %10 = arith.addf %6, %9 : vector<64x128xf32>
    %11 = arith.truncf %10 : vector<64x128xf32> to vector<64x128xbf16>
    %c0_9 = arith.constant 0 : index
    %c0_10 = arith.constant 0 : index
    %c0_11 = arith.constant 0 : index
    %12 = vector.load %arg5[%c0_9, %c0_10, %c0_11] : memref<1x64x128xbf16, #tpu.memory_space<vmem>>, vector<1x64x128xbf16>
    %13 = vector.shape_cast %12 : vector<1x64x128xbf16> to vector<64x128xbf16>
    %14 = vector.shape_cast %11 : vector<64x128xbf16> to vector<1x64x128xbf16>
    tpu.vector_store %arg5[%c0_9, %c0_10, %c0_11], %14 {strides = array<i32>} : memref<1x64x128xbf16, #tpu.memory_space<vmem>>, vector<1x64x128xbf16>,
    return
  }
  func.func @transform_0(%arg0: i32, %arg1: i32) -> (i32, i32, i32) {
    %c0_i32 = arith.constant 0 : i32
    %c0_i32_0 = arith.constant 0 : i32
    return %arg0, %arg1, %c0_i32 : i32, i32, i32
  }
  func.func @transform_1(%arg0: i32, %arg1: i32) -> (i32, i32, i32) {
    %c0_i32 = arith.constant 0 : i32
    %c0_i32_0 = arith.constant 0 : i32
    %c0_i32_1 = arith.constant 0 : i32
    return %arg0, %c0_i32, %c0_i32_0 : i32, i32, i32
  }
  func.func @transform_2(%arg0: i32, %arg1: i32) -> (i32, i32, i32) {
    %c0_i32 = arith.constant 0 : i32
    %c0_i32_0 = arith.constant 0 : i32
    %c0_i32_1 = arith.constant 0 : i32
    return %arg0, %c0_i32, %c0_i32_0 : i32, i32, i32
  }
  func.func @transform_3(%arg0: i32, %arg1: i32) -> (i32, i32, i32) {
    %c0_i32 = arith.constant 0 : i32
    %c0_i32_0 = arith.constant 0 : i32
    return %arg0, %arg1, %c0_i32 : i32, i32, i32
  }
}

module attributes {stable_mosaic.version = 11 : i64} {
  func.func @kernel(%arg0: i32, %arg1: i32, %arg2: memref<1x64x256xbf16, #tpu.memory_space<vmem>>, %arg3: memref<1x256x128xbf16, #tpu.memory_space<vmem>>, %arg4: memref<1x1x128xf32, #tpu.memory_space<vmem>>, %arg5: memref<1x64x128xbf16, #tpu.memory_space<vmem>>) attributes {dimension_semantics = [#tpu.dimension_semantics<parallel>, #tpu.dimension_semantics<parallel>], iteration_bounds = array<i64: 1, 2>, scalar_prefetch = 0 : i64, scratch_operands = 0 : i64, tpu.core_type = #tpu.core_type<tc>, window_params = [{transform_indices = @transform_0, window_bounds = array<i64: 1, 64, 256>}, {transform_indices = @transform_1, window_bounds = array<i64: 1, 256, 128>}, {transform_indices = @transform_2, window_bounds = array<i64: 1, 1, 128>}, {transform_indices = @transform_3, window_bounds = array<i64: 1, 64, 128>}]} {
    %c0 = arith.constant 0 : index
    %c0_0 = arith.constant 0 : index
    %c0_1 = arith.constant 0 : index
    %0 = vector.load %arg2[%c0, %c0_0, %c0_1] : memref<1x64x256xbf16, #tpu.memory_space<vmem>>, vector<1x64x256xbf16>
    %1 = vector.shape_cast %0 : vector<1x64x256xbf16> to vector<64x256xbf16>
    %c0_2 = arith.constant 0 : index
    %c0_3 = arith.constant 0 : index
    %c0_4 = arith.constant 0 : index
    %2 = vector.load %arg3[%c0_2, %c0_3, %c0_4] : memref<1x256x128xbf16, #tpu.memory_space<vmem>>, vector<1x256x128xbf16>
    %3 = vector.shape_cast %2 : vector<1x256x128xbf16> to vector<256x128xbf16>
    %cst = arith.constant dense<0.000000e+00> : vector<64x128xf32>
    %4 = tpu.matmul %1, %3, %cst {dimension_numbers = #tpu.dot_dimension_numbers<[1], [0], [0], [1], [0, 0, 1, 1], [], []>} : vector<64x256xbf16>, vector<256x128xbf16>, vector<64x128xf32> -> vector<64x128xf32>
    %c0_5 = arith.constant 0 : index
    %c0_6 = arith.constant 0 : index
    %c0_7 = arith.constant 0 : index
    %5 = vector.load %arg4[%c0_5, %c0_6, %c0_7] : memref<1x1x128xf32, #tpu.memory_space<vmem>>, vector<1x1x128xf32>
    %6 = vector.shape_cast %5 : vector<1x1x128xf32> to vector<1x128xf32>
    %7 = vector.broadcast %6 : vector<1x128xf32> to vector<64x128xf32>
    %8 = arith.addf %4, %7 : vector<64x128xf32>
    %9 = arith.truncf %8 : vector<64x128xf32> to vector<64x128xbf16>
    %c0_8 = arith.constant 0 : index
    %c0_9 = arith.constant 0 : index
    %c0_10 = arith.constant 0 : index
    %10 = vector.load %arg5[%c0_8, %c0_9, %c0_10] : memref<1x64x128xbf16, #tpu.memory_space<vmem>>, vector<1x64x128xbf16>
    %11 = vector.shape_cast %10 : vector<1x64x128xbf16> to vector<64x128xbf16>
    %12 = vector.shape_cast %9 : vector<64x128xbf16> to vector<1x64x128xbf16>
    tpu.vector_store %arg5[%c0_8, %c0_9, %c0_10], %12 {strides = array<i32>} : memref<1x64x128xbf16, #tpu.memory_space<vmem>>, vector<1x64x128xbf16>,
    return
  }
  func.func @transform_0(%arg0: i32, %arg1: i32) -> (i32, i32, i32) {
    %c0_i32 = arith.constant 0 : i32
    %c0_i32_0 = arith.constant 0 : i32
    return %arg0, %arg1, %c0_i32 : i32, i32, i32
  }
  func.func @transform_1(%arg0: i32, %arg1: i32) -> (i32, i32, i32) {
    %c0_i32 = arith.constant 0 : i32
    %c0_i32_0 = arith.constant 0 : i32
    %c0_i32_1 = arith.constant 0 : i32
    return %arg0, %c0_i32, %c0_i32_0 : i32, i32, i32
  }
  func.func @transform_2(%arg0: i32, %arg1: i32) -> (i32, i32, i32) {
    %c0_i32 = arith.constant 0 : i32
    %c0_i32_0 = arith.constant 0 : i32
    %c0_i32_1 = arith.constant 0 : i32
    return %arg0, %c0_i32, %c0_i32_0 : i32, i32, i32
  }
  func.func @transform_3(%arg0: i32, %arg1: i32) -> (i32, i32, i32) {
    %c0_i32 = arith.constant 0 : i32
    %c0_i32_0 = arith.constant 0 : i32
    return %arg0, %arg1, %c0_i32 : i32, i32, i32
  }
}

module attributes {stable_mosaic.version = 11 : i64} {
  func.func @kernel(%arg0: i32, %arg1: i32, %arg2: memref<1x512x128xbf16, #tpu.memory_space<vmem>>, %arg3: memref<1x128x128xbf16, #tpu.memory_space<vmem>>, %arg4: memref<1x1x128xf32, #tpu.memory_space<vmem>>, %arg5: memref<1x512x128xbf16, #tpu.memory_space<vmem>>) attributes {dimension_semantics = [#tpu.dimension_semantics<parallel>, #tpu.dimension_semantics<parallel>], iteration_bounds = array<i64: 2, 1>, scalar_prefetch = 0 : i64, scratch_operands = 0 : i64, tpu.core_type = #tpu.core_type<tc>, window_params = [{transform_indices = @transform_0, window_bounds = array<i64: 1, 512, 128>}, {transform_indices = @transform_1, window_bounds = array<i64: 1, 128, 128>}, {transform_indices = @transform_2, window_bounds = array<i64: 1, 1, 128>}, {transform_indices = @transform_3, window_bounds = array<i64: 1, 512, 128>}]} {
    %c0 = arith.constant 0 : index
    %c0_0 = arith.constant 0 : index
    %c0_1 = arith.constant 0 : index
    %0 = vector.load %arg2[%c0, %c0_0, %c0_1] : memref<1x512x128xbf16, #tpu.memory_space<vmem>>, vector<1x512x128xbf16>
    %1 = vector.shape_cast %0 : vector<1x512x128xbf16> to vector<512x128xbf16>
    %c0_2 = arith.constant 0 : index
    %c0_3 = arith.constant 0 : index
    %c0_4 = arith.constant 0 : index
    %2 = vector.load %arg3[%c0_2, %c0_3, %c0_4] : memref<1x128x128xbf16, #tpu.memory_space<vmem>>, vector<1x128x128xbf16>
    %3 = vector.shape_cast %2 : vector<1x128x128xbf16> to vector<128x128xbf16>
    %cst = arith.constant dense<0.000000e+00> : vector<512x128xf32>
    %4 = tpu.matmul %1, %3, %cst {dimension_numbers = #tpu.dot_dimension_numbers<[1], [0], [0], [1], [0, 0, 1, 1], [], []>} : vector<512x128xbf16>, vector<128x128xbf16>, vector<512x128xf32> -> vector<512x128xf32>
    %c0_5 = arith.constant 0 : index
    %c0_6 = arith.constant 0 : index
    %c0_7 = arith.constant 0 : index
    %5 = vector.load %arg4[%c0_5, %c0_6, %c0_7] : memref<1x1x128xf32, #tpu.memory_space<vmem>>, vector<1x1x128xf32>
    %6 = vector.shape_cast %5 : vector<1x1x128xf32> to vector<1x128xf32>
    %7 = vector.broadcast %6 : vector<1x128xf32> to vector<512x128xf32>
    %8 = arith.addf %4, %7 : vector<512x128xf32>
    %9 = arith.truncf %8 : vector<512x128xf32> to vector<512x128xbf16>
    %c0_8 = arith.constant 0 : index
    %c0_9 = arith.constant 0 : index
    %c0_10 = arith.constant 0 : index
    %10 = vector.load %arg5[%c0_8, %c0_9, %c0_10] : memref<1x512x128xbf16, #tpu.memory_space<vmem>>, vector<1x512x128xbf16>
    %11 = vector.shape_cast %10 : vector<1x512x128xbf16> to vector<512x128xbf16>
    %12 = vector.shape_cast %9 : vector<512x128xbf16> to vector<1x512x128xbf16>
    tpu.vector_store %arg5[%c0_8, %c0_9, %c0_10], %12 {strides = array<i32>} : memref<1x512x128xbf16, #tpu.memory_space<vmem>>, vector<1x512x128xbf16>,
    return
  }
  func.func @transform_0(%arg0: i32, %arg1: i32) -> (i32, i32, i32) {
    %c0_i32 = arith.constant 0 : i32
    %c0_i32_0 = arith.constant 0 : i32
    return %arg0, %arg1, %c0_i32 : i32, i32, i32
  }
  func.func @transform_1(%arg0: i32, %arg1: i32) -> (i32, i32, i32) {
    %c0_i32 = arith.constant 0 : i32
    %c0_i32_0 = arith.constant 0 : i32
    %c0_i32_1 = arith.constant 0 : i32
    return %arg0, %c0_i32, %c0_i32_0 : i32, i32, i32
  }
  func.func @transform_2(%arg0: i32, %arg1: i32) -> (i32, i32, i32) {
    %c0_i32 = arith.constant 0 : i32
    %c0_i32_0 = arith.constant 0 : i32
    %c0_i32_1 = arith.constant 0 : i32
    return %arg0, %c0_i32, %c0_i32_0 : i32, i32, i32
  }
  func.func @transform_3(%arg0: i32, %arg1: i32) -> (i32, i32, i32) {
    %c0_i32 = arith.constant 0 : i32
    %c0_i32_0 = arith.constant 0 : i32
    return %arg0, %arg1, %c0_i32 : i32, i32, i32
  }
}

module attributes {stable_mosaic.version = 11 : i64} {
  func.func @kernel(%arg0: i32, %arg1: i32, %arg2: memref<1x256x32xbf16, #tpu.memory_space<vmem>>, %arg3: memref<1x32x128xbf16, #tpu.memory_space<vmem>>, %arg4: memref<1x1x128xf32, #tpu.memory_space<vmem>>, %arg5: memref<1x256x128xbf16, #tpu.memory_space<vmem>>) attributes {dimension_semantics = [#tpu.dimension_semantics<parallel>, #tpu.dimension_semantics<parallel>], iteration_bounds = array<i64: 1, 2>, scalar_prefetch = 0 : i64, scratch_operands = 0 : i64, tpu.core_type = #tpu.core_type<tc>, window_params = [{transform_indices = @transform_0, window_bounds = array<i64: 1, 256, 32>}, {transform_indices = @transform_1, window_bounds = array<i64: 1, 32, 128>}, {transform_indices = @transform_2, window_bounds = array<i64: 1, 1, 128>}, {transform_indices = @transform_3, window_bounds = array<i64: 1, 256, 128>}]} {
    %c0 = arith.constant 0 : index
    %c0_0 = arith.constant 0 : index
    %c0_1 = arith.constant 0 : index
    %0 = vector.load %arg2[%c0, %c0_0, %c0_1] : memref<1x256x32xbf16, #tpu.memory_space<vmem>>, vector<1x256x32xbf16>
    %1 = vector.shape_cast %0 : vector<1x256x32xbf16> to vector<256x32xbf16>
    %c0_2 = arith.constant 0 : index
    %c0_3 = arith.constant 0 : index
    %c0_4 = arith.constant 0 : index
    %2 = vector.load %arg3[%c0_2, %c0_3, %c0_4] : memref<1x32x128xbf16, #tpu.memory_space<vmem>>, vector<1x32x128xbf16>
    %3 = vector.shape_cast %2 : vector<1x32x128xbf16> to vector<32x128xbf16>
    %cst = arith.constant dense<0.000000e+00> : vector<256x128xf32>
    %4 = tpu.matmul %1, %3, %cst {dimension_numbers = #tpu.dot_dimension_numbers<[1], [0], [0], [1], [0, 0, 1, 1], [], []>} : vector<256x32xbf16>, vector<32x128xbf16>, vector<256x128xf32> -> vector<256x128xf32>
    %c0_5 = arith.constant 0 : index
    %c0_6 = arith.constant 0 : index
    %c0_7 = arith.constant 0 : index
    %5 = vector.load %arg4[%c0_5, %c0_6, %c0_7] : memref<1x1x128xf32, #tpu.memory_space<vmem>>, vector<1x1x128xf32>
    %6 = vector.shape_cast %5 : vector<1x1x128xf32> to vector<1x128xf32>
    %7 = vector.broadcast %6 : vector<1x128xf32> to vector<256x128xf32>
    %8 = arith.addf %4, %7 : vector<256x128xf32>
    %9 = arith.truncf %8 : vector<256x128xf32> to vector<256x128xbf16>
    %c0_8 = arith.constant 0 : index
    %c0_9 = arith.constant 0 : index
    %c0_10 = arith.constant 0 : index
    %10 = vector.load %arg5[%c0_8, %c0_9, %c0_10] : memref<1x256x128xbf16, #tpu.memory_space<vmem>>, vector<1x256x128xbf16>
    %11 = vector.shape_cast %10 : vector<1x256x128xbf16> to vector<256x128xbf16>
    %12 = vector.shape_cast %9 : vector<256x128xbf16> to vector<1x256x128xbf16>
    tpu.vector_store %arg5[%c0_8, %c0_9, %c0_10], %12 {strides = array<i32>} : memref<1x256x128xbf16, #tpu.memory_space<vmem>>, vector<1x256x128xbf16>,
    return
  }
  func.func @transform_0(%arg0: i32, %arg1: i32) -> (i32, i32, i32) {
    %c0_i32 = arith.constant 0 : i32
    %c0_i32_0 = arith.constant 0 : i32
    return %arg0, %arg1, %c0_i32 : i32, i32, i32
  }
  func.func @transform_1(%arg0: i32, %arg1: i32) -> (i32, i32, i32) {
    %c0_i32 = arith.constant 0 : i32
    %c0_i32_0 = arith.constant 0 : i32
    %c0_i32_1 = arith.constant 0 : i32
    return %arg0, %c0_i32, %c0_i32_0 : i32, i32, i32
  }
  func.func @transform_2(%arg0: i32, %arg1: i32) -> (i32, i32, i32) {
    %c0_i32 = arith.constant 0 : i32
    %c0_i32_0 = arith.constant 0 : i32
    %c0_i32_1 = arith.constant 0 : i32
    return %arg0, %c0_i32, %c0_i32_0 : i32, i32, i32
  }
  func.func @transform_3(%arg0: i32, %arg1: i32) -> (i32, i32, i32) {
    %c0_i32 = arith.constant 0 : i32
    %c0_i32_0 = arith.constant 0 : i32
    return %arg0, %arg1, %c0_i32 : i32, i32, i32
  }
}

module attributes {stable_mosaic.version = 11 : i64} {
  func.func @kernel(%arg0: i32, %arg1: i32, %arg2: memref<1x256x32xbf16, #tpu.memory_space<vmem>>, %arg3: memref<1x32x128xbf16, #tpu.memory_space<vmem>>, %arg4: memref<1x1x128xf32, #tpu.memory_space<vmem>>, %arg5: memref<1x256x128xbf16, #tpu.memory_space<vmem>>) attributes {dimension_semantics = [#tpu.dimension_semantics<parallel>, #tpu.dimension_semantics<parallel>], iteration_bounds = array<i64: 1, 2>, scalar_prefetch = 0 : i64, scratch_operands = 0 : i64, tpu.core_type = #tpu.core_type<tc>, window_params = [{transform_indices = @transform_0, window_bounds = array<i64: 1, 256, 32>}, {transform_indices = @transform_1, window_bounds = array<i64: 1, 32, 128>}, {transform_indices = @transform_2, window_bounds = array<i64: 1, 1, 128>}, {transform_indices = @transform_3, window_bounds = array<i64: 1, 256, 128>}]} {
    %c0 = arith.constant 0 : index
    %c0_0 = arith.constant 0 : index
    %c0_1 = arith.constant 0 : index
    %0 = vector.load %arg2[%c0, %c0_0, %c0_1] : memref<1x256x32xbf16, #tpu.memory_space<vmem>>, vector<1x256x32xbf16>
    %1 = vector.shape_cast %0 : vector<1x256x32xbf16> to vector<256x32xbf16>
    %cst = arith.constant 0.000000e+00 : bf16
    %2 = vector.broadcast %cst : bf16 to vector<256x32xbf16>
    %3 = arith.maximumf %1, %2 : vector<256x32xbf16>
    %c0_2 = arith.constant 0 : index
    %c0_3 = arith.constant 0 : index
    %c0_4 = arith.constant 0 : index
    %4 = vector.load %arg3[%c0_2, %c0_3, %c0_4] : memref<1x32x128xbf16, #tpu.memory_space<vmem>>, vector<1x32x128xbf16>
    %5 = vector.shape_cast %4 : vector<1x32x128xbf16> to vector<32x128xbf16>
    %cst_5 = arith.constant dense<0.000000e+00> : vector<256x128xf32>
    %6 = tpu.matmul %3, %5, %cst_5 {dimension_numbers = #tpu.dot_dimension_numbers<[1], [0], [0], [1], [0, 0, 1, 1], [], []>} : vector<256x32xbf16>, vector<32x128xbf16>, vector<256x128xf32> -> vector<256x128xf32>
    %c0_6 = arith.constant 0 : index
    %c0_7 = arith.constant 0 : index
    %c0_8 = arith.constant 0 : index
    %7 = vector.load %arg4[%c0_6, %c0_7, %c0_8] : memref<1x1x128xf32, #tpu.memory_space<vmem>>, vector<1x1x128xf32>
    %8 = vector.shape_cast %7 : vector<1x1x128xf32> to vector<1x128xf32>
    %9 = vector.broadcast %8 : vector<1x128xf32> to vector<256x128xf32>
    %10 = arith.addf %6, %9 : vector<256x128xf32>
    %11 = arith.truncf %10 : vector<256x128xf32> to vector<256x128xbf16>
    %c0_9 = arith.constant 0 : index
    %c0_10 = arith.constant 0 : index
    %c0_11 = arith.constant 0 : index
    %12 = vector.load %arg5[%c0_9, %c0_10, %c0_11] : memref<1x256x128xbf16, #tpu.memory_space<vmem>>, vector<1x256x128xbf16>
    %13 = vector.shape_cast %12 : vector<1x256x128xbf16> to vector<256x128xbf16>
    %14 = vector.shape_cast %11 : vector<256x128xbf16> to vector<1x256x128xbf16>
    tpu.vector_store %arg5[%c0_9, %c0_10, %c0_11], %14 {strides = array<i32>} : memref<1x256x128xbf16, #tpu.memory_space<vmem>>, vector<1x256x128xbf16>,
    return
  }
  func.func @transform_0(%arg0: i32, %arg1: i32) -> (i32, i32, i32) {
    %c0_i32 = arith.constant 0 : i32
    %c0_i32_0 = arith.constant 0 : i32
    return %arg0, %arg1, %c0_i32 : i32, i32, i32
  }
  func.func @transform_1(%arg0: i32, %arg1: i32) -> (i32, i32, i32) {
    %c0_i32 = arith.constant 0 : i32
    %c0_i32_0 = arith.constant 0 : i32
    %c0_i32_1 = arith.constant 0 : i32
    return %arg0, %c0_i32, %c0_i32_0 : i32, i32, i32
  }
  func.func @transform_2(%arg0: i32, %arg1: i32) -> (i32, i32, i32) {
    %c0_i32 = arith.constant 0 : i32
    %c0_i32_0 = arith.constant 0 : i32
    %c0_i32_1 = arith.constant 0 : i32
    return %arg0, %c0_i32, %c0_i32_0 : i32, i32, i32
  }
  func.func @transform_3(%arg0: i32, %arg1: i32) -> (i32, i32, i32) {
    %c0_i32 = arith.constant 0 : i32
    %c0_i32_0 = arith.constant 0 : i32
    return %arg0, %arg1, %c0_i32 : i32, i32, i32
  }
}

module attributes {stable_mosaic.version = 11 : i64} {
  func.func @kernel(%arg0: i32, %arg1: i32, %arg2: memref<1x64x288xbf16, #tpu.memory_space<vmem>>, %arg3: memref<1x288x128xbf16, #tpu.memory_space<vmem>>, %arg4: memref<1x1x128xf32, #tpu.memory_space<vmem>>, %arg5: memref<1x64x128xbf16, #tpu.memory_space<vmem>>) attributes {dimension_semantics = [#tpu.dimension_semantics<parallel>, #tpu.dimension_semantics<parallel>], iteration_bounds = array<i64: 1, 2>, scalar_prefetch = 0 : i64, scratch_operands = 0 : i64, tpu.core_type = #tpu.core_type<tc>, window_params = [{transform_indices = @transform_0, window_bounds = array<i64: 1, 64, 288>}, {transform_indices = @transform_1, window_bounds = array<i64: 1, 288, 128>}, {transform_indices = @transform_2, window_bounds = array<i64: 1, 1, 128>}, {transform_indices = @transform_3, window_bounds = array<i64: 1, 64, 128>}]} {
    %c0 = arith.constant 0 : index
    %c0_0 = arith.constant 0 : index
    %c0_1 = arith.constant 0 : index
    %0 = vector.load %arg2[%c0, %c0_0, %c0_1] : memref<1x64x288xbf16, #tpu.memory_space<vmem>>, vector<1x64x288xbf16>
    %1 = vector.shape_cast %0 : vector<1x64x288xbf16> to vector<64x288xbf16>
    %c0_2 = arith.constant 0 : index
    %c0_3 = arith.constant 0 : index
    %c0_4 = arith.constant 0 : index
    %2 = vector.load %arg3[%c0_2, %c0_3, %c0_4] : memref<1x288x128xbf16, #tpu.memory_space<vmem>>, vector<1x288x128xbf16>
    %3 = vector.shape_cast %2 : vector<1x288x128xbf16> to vector<288x128xbf16>
    %cst = arith.constant dense<0.000000e+00> : vector<64x128xf32>
    %4 = tpu.matmul %1, %3, %cst {dimension_numbers = #tpu.dot_dimension_numbers<[1], [0], [0], [1], [0, 0, 1, 1], [], []>} : vector<64x288xbf16>, vector<288x128xbf16>, vector<64x128xf32> -> vector<64x128xf32>
    %c0_5 = arith.constant 0 : index
    %c0_6 = arith.constant 0 : index
    %c0_7 = arith.constant 0 : index
    %5 = vector.load %arg4[%c0_5, %c0_6, %c0_7] : memref<1x1x128xf32, #tpu.memory_space<vmem>>, vector<1x1x128xf32>
    %6 = vector.shape_cast %5 : vector<1x1x128xf32> to vector<1x128xf32>
    %7 = vector.broadcast %6 : vector<1x128xf32> to vector<64x128xf32>
    %8 = arith.addf %4, %7 : vector<64x128xf32>
    %9 = arith.truncf %8 : vector<64x128xf32> to vector<64x128xbf16>
    %c0_8 = arith.constant 0 : index
    %c0_9 = arith.constant 0 : index
    %c0_10 = arith.constant 0 : index
    %10 = vector.load %arg5[%c0_8, %c0_9, %c0_10] : memref<1x64x128xbf16, #tpu.memory_space<vmem>>, vector<1x64x128xbf16>
    %11 = vector.shape_cast %10 : vector<1x64x128xbf16> to vector<64x128xbf16>
    %12 = vector.shape_cast %9 : vector<64x128xbf16> to vector<1x64x128xbf16>
    tpu.vector_store %arg5[%c0_8, %c0_9, %c0_10], %12 {strides = array<i32>} : memref<1x64x128xbf16, #tpu.memory_space<vmem>>, vector<1x64x128xbf16>,
    return
  }
  func.func @transform_0(%arg0: i32, %arg1: i32) -> (i32, i32, i32) {
    %c0_i32 = arith.constant 0 : i32
    %c0_i32_0 = arith.constant 0 : i32
    return %arg0, %arg1, %c0_i32 : i32, i32, i32
  }
  func.func @transform_1(%arg0: i32, %arg1: i32) -> (i32, i32, i32) {
    %c0_i32 = arith.constant 0 : i32
    %c0_i32_0 = arith.constant 0 : i32
    %c0_i32_1 = arith.constant 0 : i32
    return %arg0, %c0_i32, %c0_i32_0 : i32, i32, i32
  }
  func.func @transform_2(%arg0: i32, %arg1: i32) -> (i32, i32, i32) {
    %c0_i32 = arith.constant 0 : i32
    %c0_i32_0 = arith.constant 0 : i32
    %c0_i32_1 = arith.constant 0 : i32
    return %arg0, %c0_i32, %c0_i32_0 : i32, i32, i32
  }
  func.func @transform_3(%arg0: i32, %arg1: i32) -> (i32, i32, i32) {
    %c0_i32 = arith.constant 0 : i32
    %c0_i32_0 = arith.constant 0 : i32
    return %arg0, %arg1, %c0_i32 : i32, i32, i32
  }
}

module attributes {stable_mosaic.version = 11 : i64} {
  func.func @kernel(%arg0: i32, %arg1: i32, %arg2: memref<1x512x32xbf16, #tpu.memory_space<vmem>>, %arg3: memref<1x32x128xbf16, #tpu.memory_space<vmem>>, %arg4: memref<1x1x128xf32, #tpu.memory_space<vmem>>, %arg5: memref<1x512x128xbf16, #tpu.memory_space<vmem>>) attributes {dimension_semantics = [#tpu.dimension_semantics<parallel>, #tpu.dimension_semantics<parallel>], iteration_bounds = array<i64: 2, 1>, scalar_prefetch = 0 : i64, scratch_operands = 0 : i64, tpu.core_type = #tpu.core_type<tc>, window_params = [{transform_indices = @transform_0, window_bounds = array<i64: 1, 512, 32>}, {transform_indices = @transform_1, window_bounds = array<i64: 1, 32, 128>}, {transform_indices = @transform_2, window_bounds = array<i64: 1, 1, 128>}, {transform_indices = @transform_3, window_bounds = array<i64: 1, 512, 128>}]} {
    %c0 = arith.constant 0 : index
    %c0_0 = arith.constant 0 : index
    %c0_1 = arith.constant 0 : index
    %0 = vector.load %arg2[%c0, %c0_0, %c0_1] : memref<1x512x32xbf16, #tpu.memory_space<vmem>>, vector<1x512x32xbf16>
    %1 = vector.shape_cast %0 : vector<1x512x32xbf16> to vector<512x32xbf16>
    %c0_2 = arith.constant 0 : index
    %c0_3 = arith.constant 0 : index
    %c0_4 = arith.constant 0 : index
    %2 = vector.load %arg3[%c0_2, %c0_3, %c0_4] : memref<1x32x128xbf16, #tpu.memory_space<vmem>>, vector<1x32x128xbf16>
    %3 = vector.shape_cast %2 : vector<1x32x128xbf16> to vector<32x128xbf16>
    %cst = arith.constant dense<0.000000e+00> : vector<512x128xf32>
    %4 = tpu.matmul %1, %3, %cst {dimension_numbers = #tpu.dot_dimension_numbers<[1], [0], [0], [1], [0, 0, 1, 1], [], []>} : vector<512x32xbf16>, vector<32x128xbf16>, vector<512x128xf32> -> vector<512x128xf32>
    %c0_5 = arith.constant 0 : index
    %c0_6 = arith.constant 0 : index
    %c0_7 = arith.constant 0 : index
    %5 = vector.load %arg4[%c0_5, %c0_6, %c0_7] : memref<1x1x128xf32, #tpu.memory_space<vmem>>, vector<1x1x128xf32>
    %6 = vector.shape_cast %5 : vector<1x1x128xf32> to vector<1x128xf32>
    %7 = vector.broadcast %6 : vector<1x128xf32> to vector<512x128xf32>
    %8 = arith.addf %4, %7 : vector<512x128xf32>
    %9 = arith.truncf %8 : vector<512x128xf32> to vector<512x128xbf16>
    %c0_8 = arith.constant 0 : index
    %c0_9 = arith.constant 0 : index
    %c0_10 = arith.constant 0 : index
    %10 = vector.load %arg5[%c0_8, %c0_9, %c0_10] : memref<1x512x128xbf16, #tpu.memory_space<vmem>>, vector<1x512x128xbf16>
    %11 = vector.shape_cast %10 : vector<1x512x128xbf16> to vector<512x128xbf16>
    %12 = vector.shape_cast %9 : vector<512x128xbf16> to vector<1x512x128xbf16>
    tpu.vector_store %arg5[%c0_8, %c0_9, %c0_10], %12 {strides = array<i32>} : memref<1x512x128xbf16, #tpu.memory_space<vmem>>, vector<1x512x128xbf16>,
    return
  }
  func.func @transform_0(%arg0: i32, %arg1: i32) -> (i32, i32, i32) {
    %c0_i32 = arith.constant 0 : i32
    %c0_i32_0 = arith.constant 0 : i32
    return %arg0, %arg1, %c0_i32 : i32, i32, i32
  }
  func.func @transform_1(%arg0: i32, %arg1: i32) -> (i32, i32, i32) {
    %c0_i32 = arith.constant 0 : i32
    %c0_i32_0 = arith.constant 0 : i32
    %c0_i32_1 = arith.constant 0 : i32
    return %arg0, %c0_i32, %c0_i32_0 : i32, i32, i32
  }
  func.func @transform_2(%arg0: i32, %arg1: i32) -> (i32, i32, i32) {
    %c0_i32 = arith.constant 0 : i32
    %c0_i32_0 = arith.constant 0 : i32
    %c0_i32_1 = arith.constant 0 : i32
    return %arg0, %c0_i32, %c0_i32_0 : i32, i32, i32
  }
  func.func @transform_3(%arg0: i32, %arg1: i32) -> (i32, i32, i32) {
    %c0_i32 = arith.constant 0 : i32
    %c0_i32_0 = arith.constant 0 : i32
    return %arg0, %arg1, %c0_i32 : i32, i32, i32
  }
}

module attributes {stable_mosaic.version = 11 : i64} {
  func.func @kernel(%arg0: i32, %arg1: i32, %arg2: memref<1x256x128xbf16, #tpu.memory_space<vmem>>, %arg3: memref<1x128x128xbf16, #tpu.memory_space<vmem>>, %arg4: memref<1x1x128xf32, #tpu.memory_space<vmem>>, %arg5: memref<1x256x128xbf16, #tpu.memory_space<vmem>>) attributes {dimension_semantics = [#tpu.dimension_semantics<parallel>, #tpu.dimension_semantics<parallel>], iteration_bounds = array<i64: 1, 2>, scalar_prefetch = 0 : i64, scratch_operands = 0 : i64, tpu.core_type = #tpu.core_type<tc>, window_params = [{transform_indices = @transform_0, window_bounds = array<i64: 1, 256, 128>}, {transform_indices = @transform_1, window_bounds = array<i64: 1, 128, 128>}, {transform_indices = @transform_2, window_bounds = array<i64: 1, 1, 128>}, {transform_indices = @transform_3, window_bounds = array<i64: 1, 256, 128>}]} {
    %c0 = arith.constant 0 : index
    %c0_0 = arith.constant 0 : index
    %c0_1 = arith.constant 0 : index
    %0 = vector.load %arg2[%c0, %c0_0, %c0_1] : memref<1x256x128xbf16, #tpu.memory_space<vmem>>, vector<1x256x128xbf16>
    %1 = vector.shape_cast %0 : vector<1x256x128xbf16> to vector<256x128xbf16>
    %cst = arith.constant 0.000000e+00 : bf16
    %2 = vector.broadcast %cst : bf16 to vector<256x128xbf16>
    %3 = arith.maximumf %1, %2 : vector<256x128xbf16>
    %c0_2 = arith.constant 0 : index
    %c0_3 = arith.constant 0 : index
    %c0_4 = arith.constant 0 : index
    %4 = vector.load %arg3[%c0_2, %c0_3, %c0_4] : memref<1x128x128xbf16, #tpu.memory_space<vmem>>, vector<1x128x128xbf16>
    %5 = vector.shape_cast %4 : vector<1x128x128xbf16> to vector<128x128xbf16>
    %cst_5 = arith.constant dense<0.000000e+00> : vector<256x128xf32>
    %6 = tpu.matmul %3, %5, %cst_5 {dimension_numbers = #tpu.dot_dimension_numbers<[1], [0], [0], [1], [0, 0, 1, 1], [], []>} : vector<256x128xbf16>, vector<128x128xbf16>, vector<256x128xf32> -> vector<256x128xf32>
    %c0_6 = arith.constant 0 : index
    %c0_7 = arith.constant 0 : index
    %c0_8 = arith.constant 0 : index
    %7 = vector.load %arg4[%c0_6, %c0_7, %c0_8] : memref<1x1x128xf32, #tpu.memory_space<vmem>>, vector<1x1x128xf32>
    %8 = vector.shape_cast %7 : vector<1x1x128xf32> to vector<1x128xf32>
    %9 = vector.broadcast %8 : vector<1x128xf32> to vector<256x128xf32>
    %10 = arith.addf %6, %9 : vector<256x128xf32>
    %11 = arith.truncf %10 : vector<256x128xf32> to vector<256x128xbf16>
    %c0_9 = arith.constant 0 : index
    %c0_10 = arith.constant 0 : index
    %c0_11 = arith.constant 0 : index
    %12 = vector.load %arg5[%c0_9, %c0_10, %c0_11] : memref<1x256x128xbf16, #tpu.memory_space<vmem>>, vector<1x256x128xbf16>
    %13 = vector.shape_cast %12 : vector<1x256x128xbf16> to vector<256x128xbf16>
    %14 = vector.shape_cast %11 : vector<256x128xbf16> to vector<1x256x128xbf16>
    tpu.vector_store %arg5[%c0_9, %c0_10, %c0_11], %14 {strides = array<i32>} : memref<1x256x128xbf16, #tpu.memory_space<vmem>>, vector<1x256x128xbf16>,
    return
  }
  func.func @transform_0(%arg0: i32, %arg1: i32) -> (i32, i32, i32) {
    %c0_i32 = arith.constant 0 : i32
    %c0_i32_0 = arith.constant 0 : i32
    return %arg0, %arg1, %c0_i32 : i32, i32, i32
  }
  func.func @transform_1(%arg0: i32, %arg1: i32) -> (i32, i32, i32) {
    %c0_i32 = arith.constant 0 : i32
    %c0_i32_0 = arith.constant 0 : i32
    %c0_i32_1 = arith.constant 0 : i32
    return %arg0, %c0_i32, %c0_i32_0 : i32, i32, i32
  }
  func.func @transform_2(%arg0: i32, %arg1: i32) -> (i32, i32, i32) {
    %c0_i32 = arith.constant 0 : i32
    %c0_i32_0 = arith.constant 0 : i32
    %c0_i32_1 = arith.constant 0 : i32
    return %arg0, %c0_i32, %c0_i32_0 : i32, i32, i32
  }
  func.func @transform_3(%arg0: i32, %arg1: i32) -> (i32, i32, i32) {
    %c0_i32 = arith.constant 0 : i32
    %c0_i32_0 = arith.constant 0 : i32
    return %arg0, %arg1, %c0_i32 : i32, i32, i32
  }
}

module attributes {stable_mosaic.version = 11 : i64} {
  func.func @kernel(%arg0: i32, %arg1: i32, %arg2: memref<1x64x1152xbf16, #tpu.memory_space<vmem>>, %arg3: memref<1x1152x128xbf16, #tpu.memory_space<vmem>>, %arg4: memref<1x1x128xf32, #tpu.memory_space<vmem>>, %arg5: memref<1x64x128xbf16, #tpu.memory_space<vmem>>) attributes {dimension_semantics = [#tpu.dimension_semantics<parallel>, #tpu.dimension_semantics<parallel>], iteration_bounds = array<i64: 1, 2>, scalar_prefetch = 0 : i64, scratch_operands = 0 : i64, tpu.core_type = #tpu.core_type<tc>, window_params = [{transform_indices = @transform_0, window_bounds = array<i64: 1, 64, 1152>}, {transform_indices = @transform_1, window_bounds = array<i64: 1, 1152, 128>}, {transform_indices = @transform_2, window_bounds = array<i64: 1, 1, 128>}, {transform_indices = @transform_3, window_bounds = array<i64: 1, 64, 128>}]} {
    %c0 = arith.constant 0 : index
    %c0_0 = arith.constant 0 : index
    %c0_1 = arith.constant 0 : index
    %0 = vector.load %arg2[%c0, %c0_0, %c0_1] : memref<1x64x1152xbf16, #tpu.memory_space<vmem>>, vector<1x64x1152xbf16>
    %1 = vector.shape_cast %0 : vector<1x64x1152xbf16> to vector<64x1152xbf16>
    %c0_2 = arith.constant 0 : index
    %c0_3 = arith.constant 0 : index
    %c0_4 = arith.constant 0 : index
    %2 = vector.load %arg3[%c0_2, %c0_3, %c0_4] : memref<1x1152x128xbf16, #tpu.memory_space<vmem>>, vector<1x1152x128xbf16>
    %3 = vector.shape_cast %2 : vector<1x1152x128xbf16> to vector<1152x128xbf16>
    %cst = arith.constant dense<0.000000e+00> : vector<64x128xf32>
    %4 = tpu.matmul %1, %3, %cst {dimension_numbers = #tpu.dot_dimension_numbers<[1], [0], [0], [1], [0, 0, 1, 1], [], []>} : vector<64x1152xbf16>, vector<1152x128xbf16>, vector<64x128xf32> -> vector<64x128xf32>
    %c0_5 = arith.constant 0 : index
    %c0_6 = arith.constant 0 : index
    %c0_7 = arith.constant 0 : index
    %5 = vector.load %arg4[%c0_5, %c0_6, %c0_7] : memref<1x1x128xf32, #tpu.memory_space<vmem>>, vector<1x1x128xf32>
    %6 = vector.shape_cast %5 : vector<1x1x128xf32> to vector<1x128xf32>
    %7 = vector.broadcast %6 : vector<1x128xf32> to vector<64x128xf32>
    %8 = arith.addf %4, %7 : vector<64x128xf32>
    %9 = arith.truncf %8 : vector<64x128xf32> to vector<64x128xbf16>
    %c0_8 = arith.constant 0 : index
    %c0_9 = arith.constant 0 : index
    %c0_10 = arith.constant 0 : index
    %10 = vector.load %arg5[%c0_8, %c0_9, %c0_10] : memref<1x64x128xbf16, #tpu.memory_space<vmem>>, vector<1x64x128xbf16>
    %11 = vector.shape_cast %10 : vector<1x64x128xbf16> to vector<64x128xbf16>
    %12 = vector.shape_cast %9 : vector<64x128xbf16> to vector<1x64x128xbf16>
    tpu.vector_store %arg5[%c0_8, %c0_9, %c0_10], %12 {strides = array<i32>} : memref<1x64x128xbf16, #tpu.memory_space<vmem>>, vector<1x64x128xbf16>,
    return
  }
  func.func @transform_0(%arg0: i32, %arg1: i32) -> (i32, i32, i32) {
    %c0_i32 = arith.constant 0 : i32
    %c0_i32_0 = arith.constant 0 : i32
    return %arg0, %arg1, %c0_i32 : i32, i32, i32
  }
  func.func @transform_1(%arg0: i32, %arg1: i32) -> (i32, i32, i32) {
    %c0_i32 = arith.constant 0 : i32
    %c0_i32_0 = arith.constant 0 : i32
    %c0_i32_1 = arith.constant 0 : i32
    return %arg0, %c0_i32, %c0_i32_0 : i32, i32, i32
  }
  func.func @transform_2(%arg0: i32, %arg1: i32) -> (i32, i32, i32) {
    %c0_i32 = arith.constant 0 : i32
    %c0_i32_0 = arith.constant 0 : i32
    %c0_i32_1 = arith.constant 0 : i32
    return %arg0, %c0_i32, %c0_i32_0 : i32, i32, i32
  }
  func.func @transform_3(%arg0: i32, %arg1: i32) -> (i32, i32, i32) {
    %c0_i32 = arith.constant 0 : i32
    %c0_i32_0 = arith.constant 0 : i32
    return %arg0, %arg1, %c0_i32 : i32, i32, i32
  }
}

module attributes {stable_mosaic.version = 11 : i64} {
  func.func @kernel(%arg0: i32, %arg1: i32, %arg2: memref<1x64x768xbf16, #tpu.memory_space<vmem>>, %arg3: memref<1x768x128xbf16, #tpu.memory_space<vmem>>, %arg4: memref<1x1x128xf32, #tpu.memory_space<vmem>>, %arg5: memref<1x64x128xbf16, #tpu.memory_space<vmem>>) attributes {dimension_semantics = [#tpu.dimension_semantics<parallel>, #tpu.dimension_semantics<parallel>], iteration_bounds = array<i64: 1, 2>, scalar_prefetch = 0 : i64, scratch_operands = 0 : i64, tpu.core_type = #tpu.core_type<tc>, window_params = [{transform_indices = @transform_0, window_bounds = array<i64: 1, 64, 768>}, {transform_indices = @transform_1, window_bounds = array<i64: 1, 768, 128>}, {transform_indices = @transform_2, window_bounds = array<i64: 1, 1, 128>}, {transform_indices = @transform_3, window_bounds = array<i64: 1, 64, 128>}]} {
    %c0 = arith.constant 0 : index
    %c0_0 = arith.constant 0 : index
    %c0_1 = arith.constant 0 : index
    %0 = vector.load %arg2[%c0, %c0_0, %c0_1] : memref<1x64x768xbf16, #tpu.memory_space<vmem>>, vector<1x64x768xbf16>
    %1 = vector.shape_cast %0 : vector<1x64x768xbf16> to vector<64x768xbf16>
    %cst = arith.constant 0.000000e+00 : bf16
    %2 = vector.broadcast %cst : bf16 to vector<64x768xbf16>
    %3 = arith.maximumf %1, %2 : vector<64x768xbf16>
    %c0_2 = arith.constant 0 : index
    %c0_3 = arith.constant 0 : index
    %c0_4 = arith.constant 0 : index
    %4 = vector.load %arg3[%c0_2, %c0_3, %c0_4] : memref<1x768x128xbf16, #tpu.memory_space<vmem>>, vector<1x768x128xbf16>
    %5 = vector.shape_cast %4 : vector<1x768x128xbf16> to vector<768x128xbf16>
    %cst_5 = arith.constant dense<0.000000e+00> : vector<64x128xf32>
    %6 = tpu.matmul %3, %5, %cst_5 {dimension_numbers = #tpu.dot_dimension_numbers<[1], [0], [0], [1], [0, 0, 1, 1], [], []>} : vector<64x768xbf16>, vector<768x128xbf16>, vector<64x128xf32> -> vector<64x128xf32>
    %c0_6 = arith.constant 0 : index
    %c0_7 = arith.constant 0 : index
    %c0_8 = arith.constant 0 : index
    %7 = vector.load %arg4[%c0_6, %c0_7, %c0_8] : memref<1x1x128xf32, #tpu.memory_space<vmem>>, vector<1x1x128xf32>
    %8 = vector.shape_cast %7 : vector<1x1x128xf32> to vector<1x128xf32>
    %9 = vector.broadcast %8 : vector<1x128xf32> to vector<64x128xf32>
    %10 = arith.addf %6, %9 : vector<64x128xf32>
    %11 = arith.truncf %10 : vector<64x128xf32> to vector<64x128xbf16>
    %c0_9 = arith.constant 0 : index
    %c0_10 = arith.constant 0 : index
    %c0_11 = arith.constant 0 : index
    %12 = vector.load %arg5[%c0_9, %c0_10, %c0_11] : memref<1x64x128xbf16, #tpu.memory_space<vmem>>, vector<1x64x128xbf16>
    %13 = vector.shape_cast %12 : vector<1x64x128xbf16> to vector<64x128xbf16>
    %14 = vector.shape_cast %11 : vector<64x128xbf16> to vector<1x64x128xbf16>
    tpu.vector_store %arg5[%c0_9, %c0_10, %c0_11], %14 {strides = array<i32>} : memref<1x64x128xbf16, #tpu.memory_space<vmem>>, vector<1x64x128xbf16>,
    return
  }
  func.func @transform_0(%arg0: i32, %arg1: i32) -> (i32, i32, i32) {
    %c0_i32 = arith.constant 0 : i32
    %c0_i32_0 = arith.constant 0 : i32
    return %arg0, %arg1, %c0_i32 : i32, i32, i32
  }
  func.func @transform_1(%arg0: i32, %arg1: i32) -> (i32, i32, i32) {
    %c0_i32 = arith.constant 0 : i32
    %c0_i32_0 = arith.constant 0 : i32
    %c0_i32_1 = arith.constant 0 : i32
    return %arg0, %c0_i32, %c0_i32_0 : i32, i32, i32
  }
  func.func @transform_2(%arg0: i32, %arg1: i32) -> (i32, i32, i32) {
    %c0_i32 = arith.constant 0 : i32
    %c0_i32_0 = arith.constant 0 : i32
    %c0_i32_1 = arith.constant 0 : i32
    return %arg0, %c0_i32, %c0_i32_0 : i32, i32, i32
  }
  func.func @transform_3(%arg0: i32, %arg1: i32) -> (i32, i32, i32) {
    %c0_i32 = arith.constant 0 : i32
    %c0_i32_0 = arith.constant 0 : i32
    return %arg0, %arg1, %c0_i32 : i32, i32, i32
  }
}

module attributes {stable_mosaic.version = 11 : i64} {
  func.func @kernel(%arg0: i32, %arg1: i32, %arg2: memref<1x256x768xbf16, #tpu.memory_space<vmem>>, %arg3: memref<1x768x128xbf16, #tpu.memory_space<vmem>>, %arg4: memref<1x1x128xf32, #tpu.memory_space<vmem>>, %arg5: memref<1x256x128xbf16, #tpu.memory_space<vmem>>) attributes {dimension_semantics = [#tpu.dimension_semantics<parallel>, #tpu.dimension_semantics<parallel>], iteration_bounds = array<i64: 1, 2>, scalar_prefetch = 0 : i64, scratch_operands = 0 : i64, tpu.core_type = #tpu.core_type<tc>, window_params = [{transform_indices = @transform_0, window_bounds = array<i64: 1, 256, 768>}, {transform_indices = @transform_1, window_bounds = array<i64: 1, 768, 128>}, {transform_indices = @transform_2, window_bounds = array<i64: 1, 1, 128>}, {transform_indices = @transform_3, window_bounds = array<i64: 1, 256, 128>}]} {
    %c0 = arith.constant 0 : index
    %c0_0 = arith.constant 0 : index
    %c0_1 = arith.constant 0 : index
    %0 = vector.load %arg2[%c0, %c0_0, %c0_1] : memref<1x256x768xbf16, #tpu.memory_space<vmem>>, vector<1x256x768xbf16>
    %1 = vector.shape_cast %0 : vector<1x256x768xbf16> to vector<256x768xbf16>
    %cst = arith.constant 0.000000e+00 : bf16
    %2 = vector.broadcast %cst : bf16 to vector<256x768xbf16>
    %3 = arith.maximumf %1, %2 : vector<256x768xbf16>
    %c0_2 = arith.constant 0 : index
    %c0_3 = arith.constant 0 : index
    %c0_4 = arith.constant 0 : index
    %4 = vector.load %arg3[%c0_2, %c0_3, %c0_4] : memref<1x768x128xbf16, #tpu.memory_space<vmem>>, vector<1x768x128xbf16>
    %5 = vector.shape_cast %4 : vector<1x768x128xbf16> to vector<768x128xbf16>
    %cst_5 = arith.constant dense<0.000000e+00> : vector<256x128xf32>
    %6 = tpu.matmul %3, %5, %cst_5 {dimension_numbers = #tpu.dot_dimension_numbers<[1], [0], [0], [1], [0, 0, 1, 1], [], []>} : vector<256x768xbf16>, vector<768x128xbf16>, vector<256x128xf32> -> vector<256x128xf32>
    %c0_6 = arith.constant 0 : index
    %c0_7 = arith.constant 0 : index
    %c0_8 = arith.constant 0 : index
    %7 = vector.load %arg4[%c0_6, %c0_7, %c0_8] : memref<1x1x128xf32, #tpu.memory_space<vmem>>, vector<1x1x128xf32>
    %8 = vector.shape_cast %7 : vector<1x1x128xf32> to vector<1x128xf32>
    %9 = vector.broadcast %8 : vector<1x128xf32> to vector<256x128xf32>
    %10 = arith.addf %6, %9 : vector<256x128xf32>
    %11 = arith.truncf %10 : vector<256x128xf32> to vector<256x128xbf16>
    %c0_9 = arith.constant 0 : index
    %c0_10 = arith.constant 0 : index
    %c0_11 = arith.constant 0 : index
    %12 = vector.load %arg5[%c0_9, %c0_10, %c0_11] : memref<1x256x128xbf16, #tpu.memory_space<vmem>>, vector<1x256x128xbf16>
    %13 = vector.shape_cast %12 : vector<1x256x128xbf16> to vector<256x128xbf16>
    %14 = vector.shape_cast %11 : vector<256x128xbf16> to vector<1x256x128xbf16>
    tpu.vector_store %arg5[%c0_9, %c0_10, %c0_11], %14 {strides = array<i32>} : memref<1x256x128xbf16, #tpu.memory_space<vmem>>, vector<1x256x128xbf16>,
    return
  }
  func.func @transform_0(%arg0: i32, %arg1: i32) -> (i32, i32, i32) {
    %c0_i32 = arith.constant 0 : i32
    %c0_i32_0 = arith.constant 0 : i32
    return %arg0, %arg1, %c0_i32 : i32, i32, i32
  }
  func.func @transform_1(%arg0: i32, %arg1: i32) -> (i32, i32, i32) {
    %c0_i32 = arith.constant 0 : i32
    %c0_i32_0 = arith.constant 0 : i32
    %c0_i32_1 = arith.constant 0 : i32
    return %arg0, %c0_i32, %c0_i32_0 : i32, i32, i32
  }
  func.func @transform_2(%arg0: i32, %arg1: i32) -> (i32, i32, i32) {
    %c0_i32 = arith.constant 0 : i32
    %c0_i32_0 = arith.constant 0 : i32
    %c0_i32_1 = arith.constant 0 : i32
    return %arg0, %c0_i32, %c0_i32_0 : i32, i32, i32
  }
  func.func @transform_3(%arg0: i32, %arg1: i32) -> (i32, i32, i32) {
    %c0_i32 = arith.constant 0 : i32
    %c0_i32_0 = arith.constant 0 : i32
    return %arg0, %arg1, %c0_i32 : i32, i32, i32
  }
}

module attributes {stable_mosaic.version = 11 : i64} {
  func.func @kernel(%arg0: i32, %arg1: i32, %arg2: memref<1x512x768xbf16, #tpu.memory_space<vmem>>, %arg3: memref<1x768x128xbf16, #tpu.memory_space<vmem>>, %arg4: memref<1x1x128xf32, #tpu.memory_space<vmem>>, %arg5: memref<1x512x128xbf16, #tpu.memory_space<vmem>>) attributes {dimension_semantics = [#tpu.dimension_semantics<parallel>, #tpu.dimension_semantics<parallel>], iteration_bounds = array<i64: 2, 1>, scalar_prefetch = 0 : i64, scratch_operands = 0 : i64, tpu.core_type = #tpu.core_type<tc>, window_params = [{transform_indices = @transform_0, window_bounds = array<i64: 1, 512, 768>}, {transform_indices = @transform_1, window_bounds = array<i64: 1, 768, 128>}, {transform_indices = @transform_2, window_bounds = array<i64: 1, 1, 128>}, {transform_indices = @transform_3, window_bounds = array<i64: 1, 512, 128>}]} {
    %c0 = arith.constant 0 : index
    %c0_0 = arith.constant 0 : index
    %c0_1 = arith.constant 0 : index
    %0 = vector.load %arg2[%c0, %c0_0, %c0_1] : memref<1x512x768xbf16, #tpu.memory_space<vmem>>, vector<1x512x768xbf16>
    %1 = vector.shape_cast %0 : vector<1x512x768xbf16> to vector<512x768xbf16>
    %cst = arith.constant 0.000000e+00 : bf16
    %2 = vector.broadcast %cst : bf16 to vector<512x768xbf16>
    %3 = arith.maximumf %1, %2 : vector<512x768xbf16>
    %c0_2 = arith.constant 0 : index
    %c0_3 = arith.constant 0 : index
    %c0_4 = arith.constant 0 : index
    %4 = vector.load %arg3[%c0_2, %c0_3, %c0_4] : memref<1x768x128xbf16, #tpu.memory_space<vmem>>, vector<1x768x128xbf16>
    %5 = vector.shape_cast %4 : vector<1x768x128xbf16> to vector<768x128xbf16>
    %cst_5 = arith.constant dense<0.000000e+00> : vector<512x128xf32>
    %6 = tpu.matmul %3, %5, %cst_5 {dimension_numbers = #tpu.dot_dimension_numbers<[1], [0], [0], [1], [0, 0, 1, 1], [], []>} : vector<512x768xbf16>, vector<768x128xbf16>, vector<512x128xf32> -> vector<512x128xf32>
    %c0_6 = arith.constant 0 : index
    %c0_7 = arith.constant 0 : index
    %c0_8 = arith.constant 0 : index
    %7 = vector.load %arg4[%c0_6, %c0_7, %c0_8] : memref<1x1x128xf32, #tpu.memory_space<vmem>>, vector<1x1x128xf32>
    %8 = vector.shape_cast %7 : vector<1x1x128xf32> to vector<1x128xf32>
    %9 = vector.broadcast %8 : vector<1x128xf32> to vector<512x128xf32>
    %10 = arith.addf %6, %9 : vector<512x128xf32>
    %11 = arith.truncf %10 : vector<512x128xf32> to vector<512x128xbf16>
    %c0_9 = arith.constant 0 : index
    %c0_10 = arith.constant 0 : index
    %c0_11 = arith.constant 0 : index
    %12 = vector.load %arg5[%c0_9, %c0_10, %c0_11] : memref<1x512x128xbf16, #tpu.memory_space<vmem>>, vector<1x512x128xbf16>
    %13 = vector.shape_cast %12 : vector<1x512x128xbf16> to vector<512x128xbf16>
    %14 = vector.shape_cast %11 : vector<512x128xbf16> to vector<1x512x128xbf16>
    tpu.vector_store %arg5[%c0_9, %c0_10, %c0_11], %14 {strides = array<i32>} : memref<1x512x128xbf16, #tpu.memory_space<vmem>>, vector<1x512x128xbf16>,
    return
  }
  func.func @transform_0(%arg0: i32, %arg1: i32) -> (i32, i32, i32) {
    %c0_i32 = arith.constant 0 : i32
    %c0_i32_0 = arith.constant 0 : i32
    return %arg0, %arg1, %c0_i32 : i32, i32, i32
  }
  func.func @transform_1(%arg0: i32, %arg1: i32) -> (i32, i32, i32) {
    %c0_i32 = arith.constant 0 : i32
    %c0_i32_0 = arith.constant 0 : i32
    %c0_i32_1 = arith.constant 0 : i32
    return %arg0, %c0_i32, %c0_i32_0 : i32, i32, i32
  }
  func.func @transform_2(%arg0: i32, %arg1: i32) -> (i32, i32, i32) {
    %c0_i32 = arith.constant 0 : i32
    %c0_i32_0 = arith.constant 0 : i32
    %c0_i32_1 = arith.constant 0 : i32
    return %arg0, %c0_i32, %c0_i32_0 : i32, i32, i32
  }
  func.func @transform_3(%arg0: i32, %arg1: i32) -> (i32, i32, i32) {
    %c0_i32 = arith.constant 0 : i32
    %c0_i32_0 = arith.constant 0 : i32
    return %arg0, %arg1, %c0_i32 : i32, i32, i32
  }
}

module attributes {stable_mosaic.version = 11 : i64} {
  func.func @kernel(%arg0: i32, %arg1: i32, %arg2: memref<1x512x768xbf16, #tpu.memory_space<vmem>>, %arg3: memref<1x768x256xbf16, #tpu.memory_space<vmem>>, %arg4: memref<1x1x256xf32, #tpu.memory_space<vmem>>, %arg5: memref<1x512x256xbf16, #tpu.memory_space<vmem>>) attributes {dimension_semantics = [#tpu.dimension_semantics<parallel>, #tpu.dimension_semantics<parallel>], iteration_bounds = array<i64: 4, 1>, scalar_prefetch = 0 : i64, scratch_operands = 0 : i64, tpu.core_type = #tpu.core_type<tc>, window_params = [{transform_indices = @transform_0, window_bounds = array<i64: 1, 512, 768>}, {transform_indices = @transform_1, window_bounds = array<i64: 1, 768, 256>}, {transform_indices = @transform_2, window_bounds = array<i64: 1, 1, 256>}, {transform_indices = @transform_3, window_bounds = array<i64: 1, 512, 256>}]} {
    %c0 = arith.constant 0 : index
    %c0_0 = arith.constant 0 : index
    %c0_1 = arith.constant 0 : index
    %0 = vector.load %arg2[%c0, %c0_0, %c0_1] : memref<1x512x768xbf16, #tpu.memory_space<vmem>>, vector<1x512x768xbf16>
    %1 = vector.shape_cast %0 : vector<1x512x768xbf16> to vector<512x768xbf16>
    %cst = arith.constant 0.000000e+00 : bf16
    %2 = vector.broadcast %cst : bf16 to vector<512x768xbf16>
    %3 = arith.maximumf %1, %2 : vector<512x768xbf16>
    %c0_2 = arith.constant 0 : index
    %c0_3 = arith.constant 0 : index
    %c0_4 = arith.constant 0 : index
    %4 = vector.load %arg3[%c0_2, %c0_3, %c0_4] : memref<1x768x256xbf16, #tpu.memory_space<vmem>>, vector<1x768x256xbf16>
    %5 = vector.shape_cast %4 : vector<1x768x256xbf16> to vector<768x256xbf16>
    %cst_5 = arith.constant dense<0.000000e+00> : vector<512x256xf32>
    %6 = tpu.matmul %3, %5, %cst_5 {dimension_numbers = #tpu.dot_dimension_numbers<[1], [0], [0], [1], [0, 0, 1, 1], [], []>} : vector<512x768xbf16>, vector<768x256xbf16>, vector<512x256xf32> -> vector<512x256xf32>
    %c0_6 = arith.constant 0 : index
    %c0_7 = arith.constant 0 : index
    %c0_8 = arith.constant 0 : index
    %7 = vector.load %arg4[%c0_6, %c0_7, %c0_8] : memref<1x1x256xf32, #tpu.memory_space<vmem>>, vector<1x1x256xf32>
    %8 = vector.shape_cast %7 : vector<1x1x256xf32> to vector<1x256xf32>
    %9 = vector.broadcast %8 : vector<1x256xf32> to vector<512x256xf32>
    %10 = arith.addf %6, %9 : vector<512x256xf32>
    %11 = arith.truncf %10 : vector<512x256xf32> to vector<512x256xbf16>
    %c0_9 = arith.constant 0 : index
    %c0_10 = arith.constant 0 : index
    %c0_11 = arith.constant 0 : index
    %12 = vector.load %arg5[%c0_9, %c0_10, %c0_11] : memref<1x512x256xbf16, #tpu.memory_space<vmem>>, vector<1x512x256xbf16>
    %13 = vector.shape_cast %12 : vector<1x512x256xbf16> to vector<512x256xbf16>
    %14 = vector.shape_cast %11 : vector<512x256xbf16> to vector<1x512x256xbf16>
    tpu.vector_store %arg5[%c0_9, %c0_10, %c0_11], %14 {strides = array<i32>} : memref<1x512x256xbf16, #tpu.memory_space<vmem>>, vector<1x512x256xbf16>,
    return
  }
  func.func @transform_0(%arg0: i32, %arg1: i32) -> (i32, i32, i32) {
    %c0_i32 = arith.constant 0 : i32
    %c0_i32_0 = arith.constant 0 : i32
    return %arg0, %arg1, %c0_i32 : i32, i32, i32
  }
  func.func @transform_1(%arg0: i32, %arg1: i32) -> (i32, i32, i32) {
    %c0_i32 = arith.constant 0 : i32
    %c0_i32_0 = arith.constant 0 : i32
    %c0_i32_1 = arith.constant 0 : i32
    return %arg0, %c0_i32, %c0_i32_0 : i32, i32, i32
  }
  func.func @transform_2(%arg0: i32, %arg1: i32) -> (i32, i32, i32) {
    %c0_i32 = arith.constant 0 : i32
    %c0_i32_0 = arith.constant 0 : i32
    %c0_i32_1 = arith.constant 0 : i32
    return %arg0, %c0_i32, %c0_i32_0 : i32, i32, i32
  }
  func.func @transform_3(%arg0: i32, %arg1: i32) -> (i32, i32, i32) {
    %c0_i32 = arith.constant 0 : i32
    %c0_i32_0 = arith.constant 0 : i32
    return %arg0, %arg1, %c0_i32 : i32, i32, i32
  }
}

module attributes {stable_mosaic.version = 11 : i64} {
  func.func @kernel(%arg0: i32, %arg1: i32, %arg2: memref<1x2x1536xbf16, #tpu.memory_space<vmem>>, %arg3: memref<1x1536x1024xbf16, #tpu.memory_space<vmem>>, %arg4: memref<1x1x1024xf32, #tpu.memory_space<vmem>>, %arg5: memref<1x2x1024xf32, #tpu.memory_space<vmem>>) attributes {dimension_semantics = [#tpu.dimension_semantics<parallel>, #tpu.dimension_semantics<parallel>], iteration_bounds = array<i64: 1, 1>, scalar_prefetch = 0 : i64, scratch_operands = 0 : i64, tpu.core_type = #tpu.core_type<tc>, window_params = [{transform_indices = @transform_0, window_bounds = array<i64: 1, 2, 1536>}, {transform_indices = @transform_1, window_bounds = array<i64: 1, 1536, 1024>}, {transform_indices = @transform_2, window_bounds = array<i64: 1, 1, 1024>}, {transform_indices = @transform_3, window_bounds = array<i64: 1, 2, 1024>}]} {
    %c0 = arith.constant 0 : index
    %c0_0 = arith.constant 0 : index
    %c0_1 = arith.constant 0 : index
    %0 = vector.load %arg2[%c0, %c0_0, %c0_1] : memref<1x2x1536xbf16, #tpu.memory_space<vmem>>, vector<1x2x1536xbf16>
    %1 = vector.shape_cast %0 : vector<1x2x1536xbf16> to vector<2x1536xbf16>
    %c0_2 = arith.constant 0 : index
    %c0_3 = arith.constant 0 : index
    %c0_4 = arith.constant 0 : index
    %2 = vector.load %arg3[%c0_2, %c0_3, %c0_4] : memref<1x1536x1024xbf16, #tpu.memory_space<vmem>>, vector<1x1536x1024xbf16>
    %3 = vector.shape_cast %2 : vector<1x1536x1024xbf16> to vector<1536x1024xbf16>
    %cst = arith.constant dense<0.000000e+00> : vector<2x1024xf32>
    %4 = tpu.matmul %1, %3, %cst {dimension_numbers = #tpu.dot_dimension_numbers<[1], [0], [0], [1], [0, 0, 1, 1], [], []>} : vector<2x1536xbf16>, vector<1536x1024xbf16>, vector<2x1024xf32> -> vector<2x1024xf32>
    %c0_5 = arith.constant 0 : index
    %c0_6 = arith.constant 0 : index
    %c0_7 = arith.constant 0 : index
    %5 = vector.load %arg4[%c0_5, %c0_6, %c0_7] : memref<1x1x1024xf32, #tpu.memory_space<vmem>>, vector<1x1x1024xf32>
    %6 = vector.shape_cast %5 : vector<1x1x1024xf32> to vector<1x1024xf32>
    %7 = vector.broadcast %6 : vector<1x1024xf32> to vector<2x1024xf32>
    %8 = arith.addf %4, %7 : vector<2x1024xf32>
    %c0_8 = arith.constant 0 : index
    %c0_9 = arith.constant 0 : index
    %c0_10 = arith.constant 0 : index
    %9 = vector.load %arg5[%c0_8, %c0_9, %c0_10] : memref<1x2x1024xf32, #tpu.memory_space<vmem>>, vector<1x2x1024xf32>
    %10 = vector.shape_cast %9 : vector<1x2x1024xf32> to vector<2x1024xf32>
    %11 = vector.shape_cast %8 : vector<2x1024xf32> to vector<1x2x1024xf32>
    tpu.vector_store %arg5[%c0_8, %c0_9, %c0_10], %11 {strides = array<i32>} : memref<1x2x1024xf32, #tpu.memory_space<vmem>>, vector<1x2x1024xf32>,
    return
  }
  func.func @transform_0(%arg0: i32, %arg1: i32) -> (i32, i32, i32) {
    %c0_i32 = arith.constant 0 : i32
    %c0_i32_0 = arith.constant 0 : i32
    return %arg0, %arg1, %c0_i32 : i32, i32, i32
  }
  func.func @transform_1(%arg0: i32, %arg1: i32) -> (i32, i32, i32) {
    %c0_i32 = arith.constant 0 : i32
    %c0_i32_0 = arith.constant 0 : i32
    %c0_i32_1 = arith.constant 0 : i32
    return %arg0, %c0_i32, %c0_i32_0 : i32, i32, i32
  }
  func.func @transform_2(%arg0: i32, %arg1: i32) -> (i32, i32, i32) {
    %c0_i32 = arith.constant 0 : i32
    %c0_i32_0 = arith.constant 0 : i32
    %c0_i32_1 = arith.constant 0 : i32
    return %arg0, %c0_i32, %c0_i32_0 : i32, i32, i32
  }
  func.func @transform_3(%arg0: i32, %arg1: i32) -> (i32, i32, i32) {
    %c0_i32 = arith.constant 0 : i32
    %c0_i32_0 = arith.constant 0 : i32
    return %arg0, %arg1, %c0_i32 : i32, i32, i32
  }
}

</mosaic_0001>

<bundles_post_ra>
// kernel: squeeze.55
= control target key start
LH: loop header
LB: loop body
LE: loop exit
PB: predicated region body
PF: predicated region fallthrough
CT: control target
= control target key end

     0   :  { %2 = vsyncpa [#allocation1], 0  ;;  %s375_s6 = smov [#allocation0]   ;;  %s447_s0 = inlined_call_operand.hbm [shape: bf16[1,32,256], index: 0, kind: input, shape index: {}]   ;;  %s448_s1 = inlined_call_operand.vmem [shape: bf16[2,4,4,256], index: 1, kind: output, shape index: {}]  }
   0x1   :  { %s7_s7 = sshll.u32 %s375_s6, 4  ;;  %s351_s10 = scalar_lea.hbm %s447_s0, 512  ;;  %s8_s7 = int_to_ptr.vmem [resolvable:$true] %s7_s7 }
   0x2   :  { %p352_p0 = scmp.ne.s32.totalorder %s447_s0, %s351_s10  ;;  %p355_p1 = scmp.lt.u32.totalorder %s351_s10, %s447_s0 }
   0x4   :  { %p357_p2 = pnand %p355_p1, %p352_p0 }
   0x6   :  { %360 = shalt.err (!%p357_p2)
}
   0x7   :  { %s361_s15 = scalar_lea.vmem %s8_s7, 512  ;;  %p366_p4 = scmp.lt.s32.totalorder %s8_s7, %s8_s7 }
   0x8   :  { %p362_p3 = scmp.ne.s32.totalorder %s8_s7, %s361_s15  ;;  %p367_p5 = scmp.lt.s32.totalorder %s361_s15, %s361_s15 }
   0xa   :  { %p368_p6 = por %p367_p5, %p366_p4 }
   0xc   :  { %p369_p7 = pnand %p368_p6, %p362_p3 }
   0xe   :  { %372 = shalt.err (!%p369_p7)
}
   0xf   :  { %10 = dma.hbm_to_vmem [thread:$0]  %s447_s0, 512, %s8_s7, [#allocation1]  }
  0x10   :  { %373 = dma.done.wait [#allocation1], 512  }
  0x11   :  { %374 = vsyncadd [#allocation1], 4294966784  ;;  %v334_v0 = vld [vmem:[#allocation0 + $0x18] sm:$0xff]   ;;  %v338_v1 = vld [vmem:[#allocation0 + $0x10] sm:$0xff]   ;;  %v376_v18 = vmov 0.0  }
  0x12   :  { %v342_v2 = vld [vmem:[#allocation0 + $0x8] sm:$0xff]   ;;  %v335_v3 = vunpack.c.l.bf16 %v334_v0  ;;  %v336_v4 = vunpack.c.h.bf16 %v334_v0  ;;  %v339_v5 = vunpack.c.l.bf16 %v338_v1  ;;  %v340_v6 = vunpack.c.h.bf16 %v338_v1  ;;  %v346_v7 = vld [vmem:[#allocation0] sm:$0xff]  }
  0x13   :  { %v343_v8 = vunpack.c.l.bf16 %v342_v2  ;;  %v344_v9 = vunpack.c.h.bf16 %v342_v2  ;;  %v347_v10 = vunpack.c.l.bf16 %v346_v7  ;;  %v348_v11 = vunpack.c.h.bf16 %v346_v7 }
  0x14   :  { %164 = vst [vmem:[#allocation2 + $0x40] ss:$16 sps:$4 sm:$0xff] %v339_v5   ;;  %170 = vst [vmem:[#allocation2 + $0x48] ss:$16 sps:$4 sm:$0xff] %v340_v6  }
  0x15   :  { %176 = vst [vmem:[#allocation2 + $0x60] ss:$16 sps:$4 sm:$0xff] %v335_v3   ;;  %182 = vst [vmem:[#allocation2 + $0x68] ss:$16 sps:$4 sm:$0xff] %v336_v4  }
  0x16   :  { %140 = vst [vmem:[#allocation2] ss:$16 sps:$4 sm:$0xff] %v347_v10   ;;  %146 = vst [vmem:[#allocation2 + $0x8] ss:$16 sps:$4 sm:$0xff] %v348_v11  }
  0x17   :  { %152 = vst [vmem:[#allocation2 + $0x20] ss:$16 sps:$4 sm:$0xff] %v343_v8   ;;  %158 = vst [vmem:[#allocation2 + $0x28] ss:$16 sps:$4 sm:$0xff] %v344_v9  }
  0x1b   :  { %v242_v12 = vld [vmem:[#allocation2 + $0x40] sm:$0xf]  ;;  %v249_v13 = vld [vmem:[#allocation2 + $0x48] sm:$0xf]  ;;  %v256_v14 = vld [vmem:[#allocation2 + $0x50] sm:$0xf] }
  0x1c   :  { %v243_v19 = vpack.c.bf16 %v376_v18, %v242_v12  ;;  %v250_v20 = vpack.c.bf16 %v376_v18, %v249_v13  ;;  %v257_v21 = vpack.c.bf16 %v376_v18, %v256_v14  ;;  %v263_v33 = vld [vmem:[#allocation2 + $0x58] sm:$0xf]  ;;  %v270_v37 = vld [vmem:[#allocation2 + $0x60] sm:$0xf]  ;;  %v277_v38 = vld [vmem:[#allocation2 + $0x68] sm:$0xf] }
  0x1d   :  { %v189_v15 = vld [vmem:[#allocation2] sm:$0xf]  ;;  %v194_v16 = vld [vmem:[#allocation2 + $0x8] sm:$0xf]  ;;  %v200_v17 = vld [vmem:[#allocation2 + $0x10] sm:$0xf]  ;;  %v264_v36 = vpack.c.bf16 %v376_v18, %v263_v33  ;;  %v271_v40 = vpack.c.bf16 %v376_v18, %v270_v37  ;;  %v278_v41 = vpack.c.bf16 %v376_v18, %v277_v38 }
  0x1e   :  { %v190_v22 = vpack.c.bf16 %v376_v18, %v189_v15  ;;  %v195_v23 = vpack.c.bf16 %v376_v18, %v194_v16  ;;  %v201_v24 = vpack.c.bf16 %v376_v18, %v200_v17  ;;  %v207_v25 = vld [vmem:[#allocation2 + $0x18] sm:$0xf]  ;;  %v214_v26 = vld [vmem:[#allocation2 + $0x20] sm:$0xf]  ;;  %v221_v27 = vld [vmem:[#allocation2 + $0x28] sm:$0xf] }
  0x1f   :  { %v208_v28 = vpack.c.bf16 %v376_v18, %v207_v25  ;;  %v215_v29 = vpack.c.bf16 %v376_v18, %v214_v26  ;;  %v222_v30 = vpack.c.bf16 %v376_v18, %v221_v27  ;;  %v228_v31 = vld [vmem:[#allocation2 + $0x30] sm:$0xf]  ;;  %v235_v32 = vld [vmem:[#allocation2 + $0x38] sm:$0xf]  ;;  %325 = vst [vmem:[%s448_s1 + $0x10] sm:$0x3] %v243_v19 }
  0x20   :  { %326 = vst [vmem:[%s448_s1 + $0x12] sm:$0x3] %v250_v20  ;;  %327 = vst [vmem:[%s448_s1 + $0x14] sm:$0x3] %v257_v21  ;;  %v229_v34 = vpack.c.bf16 %v376_v18, %v228_v31  ;;  %v236_v35 = vpack.c.bf16 %v376_v18, %v235_v32  ;;  %v284_v39 = vld [vmem:[#allocation2 + $0x70] sm:$0xf] }
  0x21   :  { %192 = vst [vmem:[%s448_s1] sm:$0x3] %v190_v22  ;;  %318 = vst [vmem:[%s448_s1 + $0x2] sm:$0x3] %v195_v23  ;;  %v285_v42 = vpack.c.bf16 %v376_v18, %v284_v39  ;;  %v291_v43 = vld [vmem:[#allocation2 + $0x78] sm:$0xf] }
  0x22   :  { %319 = vst [vmem:[%s448_s1 + $0x4] sm:$0x3] %v201_v24  ;;  %320 = vst [vmem:[%s448_s1 + $0x6] sm:$0x3] %v208_v28  ;;  %v292_v44 = vpack.c.bf16 %v376_v18, %v291_v43 }
  0x23   :  { %321 = vst [vmem:[%s448_s1 + $0x8] sm:$0x3] %v215_v29  ;;  %322 = vst [vmem:[%s448_s1 + $0xa] sm:$0x3] %v222_v30 }
  0x24   :  { %323 = vst [vmem:[%s448_s1 + $0xc] sm:$0x3] %v229_v34  ;;  %324 = vst [vmem:[%s448_s1 + $0xe] sm:$0x3] %v236_v35 }
  0x25   :  { %328 = vst [vmem:[%s448_s1 + $0x16] sm:$0x3] %v264_v36  ;;  %329 = vst [vmem:[%s448_s1 + $0x18] sm:$0x3] %v271_v40 }
  0x26   :  { %330 = vst [vmem:[%s448_s1 + $0x1a] sm:$0x3] %v278_v41  ;;  %331 = vst [vmem:[%s448_s1 + $0x1c] sm:$0x3] %v285_v42 }
  0x27   :  { %332 = vst [vmem:[%s448_s1 + $0x1e] sm:$0x3] %v292_v44 }
  0x28   :  { %297 = vsyncpa [#allocation1], 1 }

</bundles_post_ra>
